<compile_context>
chip_gen: v5e
topology: v5e:2x2
jax: 0.10.0
libtpu: 0.0.40
codegen_flags: <defaults>
</compile_context>

<pallas_src>
import functools

import jax
import jax.numpy as jnp
import numpy as np
from jax.experimental import pallas as pl
from jax.experimental.pallas import tpu as pltpu

_EPS = 1e-5
_MXU_DTYPE = jnp.bfloat16   # matmul operand dtype; accumulation / elementwise in f32


def _gelu(x):
    # tanh-approximate GELU (EUP tanh slot; ~1e-3 abs err vs PyTorch's exact erf GELU).
    # TODO(synk): switch to exact erf GELU if/when lax.erf lowering is required bit-exact.
    c = np.float32(np.sqrt(2.0 / np.pi))
    return 0.5 * x * (1.0 + jnp.tanh(c * (x + np.float32(0.044715) * x * x * x)))


def _batchnorm_qlen(x, gamma, beta):
    # BatchNorm1d(q_len) on [B, L, D]: channel dim is L; training-mode batch
    # statistics over (batch, d_model) per q_len position, biased variance.
    B, L, D = x.shape
    inv_n = np.float32(1.0 / (B * D))
    s = jnp.sum(x, axis=2, keepdims=True)              # (B, L, 1)   XLU lane-reduce
    mean = jnp.sum(s, axis=0, keepdims=True) * inv_n   # (1, L, 1)
    d = x - mean
    v = jnp.sum(d * d, axis=2, keepdims=True)
    var = jnp.sum(v, axis=0, keepdims=True) * inv_n    # (1, L, 1)
    xhat = d * jax.lax.rsqrt(var + _EPS)
    return xhat * gamma[None, :, :] + beta[None, :, :]


def _layer_math(x0, params, n_heads, *, recip=lambda x: 1.0 / x):
    """One _TSTEncoderLayer (with pre-fused params) in pure jnp.

    Used both inside the Pallas kernel (recip = EUP approx reciprocal) and as
    the pure-JAX reference (recip = exact divide)."""
    (w_qkv, b_qkv, wo, bo, g_attn, b_attn, w1, b1, w2, b2, g_ffn, b_ffn) = params
    B, L, D = x0.shape
    dk = D // n_heads
    mxu = w_qkv.dtype

    # --- fused QKV projection: one wide (B*L, D) @ (D, 3D) MXU matmul ---
    x2 = x0.reshape(B * L, D).astype(mxu)
    qkv = jnp.dot(x2, w_qkv, preferred_element_type=jnp.float32) + b_qkv   # (B*L, 3D)
    q = qkv[:, 0 * D:1 * D].reshape(B, L, D)   # 1/sqrt(d_k) already folded into Wq/bq
    k = qkv[:, 1 * D:2 * D].reshape(B, L, D)
    v = qkv[:, 2 * D:3 * D].reshape(B, L, D)

    # --- per-head scaled dot-product attention (static unroll over heads) ---
    # TODO(synk): for long q_len use flash-style K/V tiling so the (B,L,L)
    # score tensor never materializes (v7x 64 MiB VMEM).
    ctx_heads = []
    for h in range(n_heads):
        qh = q[:, :, h * dk:(h + 1) * dk].astype(mxu)
        kh = k[:, :, h * dk:(h + 1) * dk].astype(mxu)
        vh = v[:, :, h * dk:(h + 1) * dk].astype(mxu)
        s = jnp.einsum('bld,bmd->blm', qh, kh,
                       preferred_element_type=jnp.float32)
        s = s - jnp.max(s, axis=-1, keepdims=True)
        e = jnp.exp(s)
        p = e * recip(jnp.sum(e, axis=-1, keepdims=True))
        ctx_heads.append(jnp.einsum('blm,bmd->bld', p.astype(mxu), vh,
                                    preferred_element_type=jnp.float32))
    ctx = jnp.concatenate(ctx_heads, axis=-1).reshape(B * L, D)

    # --- single full-width output projection (K = d_model, not d_v) ---
    attn_out = (jnp.dot(ctx.astype(mxu), wo,
                        preferred_element_type=jnp.float32) + bo).reshape(B, L, D)

    # residual + BatchNorm1d(q_len)      (res_dropout=0.0 -> identity)
    x1 = _batchnorm_qlen(x0 + attn_out, g_attn, b_attn)

    # --- feed-forward (flattened (B*L, .) matmuls) ---
    x1f = x1.reshape(B * L, D).astype(mxu)
    h1 = jnp.dot(x1f, w1, preferred_element_type=jnp.float32) + b1
    h1 = _gelu(h1)
    ffn = (jnp.dot(h1.astype(mxu), w2,
                   preferred_element_type=jnp.float32) + b2).reshape(B, L, D)

    # residual + BatchNorm1d(q_len)
    return _batchnorm_qlen(x1 + ffn, g_ffn, b_ffn)


# ------------------------- Pallas kernel -------------------------

def _tst_encoder_kernel(n_heads, src_ref, *refs):
    # refs = (12 stacked-param refs..., out_ref, act_ref). grid axis 0 = layer idx.
    *param_refs, out_ref, act_ref = refs
    layer = pl.program_id(0)

    # Layer 0: seed the f32 VMEM-resident activation accumulator.
    @pl.when(layer == 0)
    def _():
        act_ref[...] = src_ref[...].astype(jnp.float32)

    params = tuple(r[0] for r in param_refs)          # drop the layer axis
    act_ref[...] = _layer_math(act_ref[...], params, n_heads,
                               recip=lambda x: pl.reciprocal(x, approx=True))

    # Last layer: single HBM writeback of the final activation.
    @pl.when(layer == pl.num_programs(0) - 1)
    def _():
        out_ref[...] = act_ref[...].astype(out_ref.dtype)


def prepare_layer_params(raw, scale, mxu_dtype=_MXU_DTYPE):
    """One-time parameter transform: fold the 1/sqrt(d_k) attention scale into
    Wq/bq, fuse Q/K/V into one (D, 3D) operand, cast MXU operands to bf16
    (biases / BN affine stay f32)."""
    (wq, bq, wk, bk, wv, bv, wo, bo,
     g_attn, b_attn, w1, b1, w2, b2, g_ffn, b_ffn) = raw
    w_qkv = jnp.concatenate([wq * scale, wk, wv], axis=1).astype(mxu_dtype)
    b_qkv = jnp.concatenate([bq * scale, bk, bv], axis=1).astype(jnp.float32)
    return (w_qkv, b_qkv,
            wo.astype(mxu_dtype), bo.astype(jnp.float32),
            g_attn, b_attn,
            w1.astype(mxu_dtype), b1.astype(jnp.float32),
            w2.astype(mxu_dtype), b2.astype(jnp.float32),
            g_ffn, b_ffn)


def tst_encoder(src, layer_params_list, n_heads):
    """Full n_layers _TSTEncoder forward in ONE pallas_call."""
    B, L, D = src.shape
    n_layers = len(layer_params_list)
    scale = np.float32(1.0 / np.sqrt(D // n_heads))
    prepared = [prepare_layer_params(p, scale) for p in layer_params_list]
    stacked = tuple(jnp.stack(ps, axis=0) for ps in zip(*prepared))

    const_spec = pl.BlockSpec((B, L, D), lambda l: (0, 0, 0))
    in_specs = [const_spec]
    for arr in stacked:
        in_specs.append(pl.BlockSpec((1,) + arr.shape[1:],
                                     lambda l: (l, 0, 0)))

    kernel = functools.partial(_tst_encoder_kernel, n_heads)
    return pl.pallas_call(
        kernel,
        out_shape=jax.ShapeDtypeStruct(src.shape, src.dtype),
        grid=(n_layers,),
        in_specs=in_specs,
        out_specs=const_spec,
        scratch_shapes=[pltpu.VMEM((B, L, D), jnp.float32)],
        compiler_params=pltpu.CompilerParams(
            dimension_semantics=("arbitrary",)),
    )(src, *stacked)


def tst_encoder_reference(src, layer_params_list, n_heads):
    """Pure-JAX reference with identical fused-parameter math (no Pallas)."""
    D = src.shape[-1]
    scale = np.float32(1.0 / np.sqrt(D // n_heads))
    out = src.astype(jnp.float32)
    for raw in layer_params_list:
        p = prepare_layer_params(raw, scale)
        out = _layer_math(out, p, n_heads)
    return out.astype(src.dtype)


# ------------------------- parameter init -------------------------

def init_layer_params(key, q_len, d_model, n_heads, d_ff):
    d_k = d_model // n_heads
    d_v = d_model // n_heads
    ks = jax.random.split(key, 12)

    def lin(k, fan_in, shape):
        bound = 1.0 / np.sqrt(fan_in)
        return jax.random.uniform(k, shape, jnp.float32, -bound, bound)

    wq = lin(ks[0], d_model, (d_model, n_heads * d_k))
    bq = lin(ks[1], d_model, (1, n_heads * d_k))
    wk = lin(ks[2], d_model, (d_model, n_heads * d_k))
    bk = lin(ks[3], d_model, (1, n_heads * d_k))
    wv = lin(ks[4], d_model, (d_model, n_heads * d_v))
    bv = lin(ks[5], d_model, (1, n_heads * d_v))
    wo = lin(ks[6], n_heads * d_v, (n_heads * d_v, d_model))
    bo = lin(ks[7], n_heads * d_v, (1, d_model))
    # BatchNorm1d(q_len) affine params (PyTorch init: gamma=1, beta=0)
    g_attn = jnp.ones((q_len, 1), jnp.float32)
    b_attn = jnp.zeros((q_len, 1), jnp.float32)
    w1 = lin(ks[8], d_model, (d_model, d_ff))
    b1 = lin(ks[9], d_model, (1, d_ff))
    w2 = lin(ks[10], d_ff, (d_ff, d_model))
    b2 = lin(ks[11], d_ff, (1, d_model))
    g_ffn = jnp.ones((q_len, 1), jnp.float32)
    b_ffn = jnp.zeros((q_len, 1), jnp.float32)
    return (wq, bq, wk, bk, wv, bv, wo, bo,
            g_attn, b_attn, w1, b1, w2, b2, g_ffn, b_ffn)


# ------------------------- demo / self-check -------------------------

if __name__ == "__main__":
    B, q_len, d_model, n_heads, d_ff, n_layers = 2, 8, 32, 4, 64, 2

    root = jax.random.PRNGKey(0)
    k_src, *k_layers = jax.random.split(root, 1 + n_layers)
    src = jax.random.normal(k_src, (B, q_len, d_model), jnp.float32)
    layer_params = [init_layer_params(k, q_len, d_model, n_heads, d_ff)
                    for k in k_layers]

    out = tst_encoder(src, layer_params, n_heads)
    out = jax.block_until_ready(out)

    ref = tst_encoder_reference(src, layer_params, n_heads)
    ref = jax.block_until_ready(ref)

    assert out.shape == (B, q_len, d_model)
    assert np.all(np.isfinite(np.asarray(out)))
    np.testing.assert_allclose(np.asarray(out), np.asarray(ref),
                               rtol=1e-2, atol=1e-2)
    print("KERNEL_OK")
</pallas_src>

<mosaic_0001>
module attributes {stable_mosaic.version = 11 : i64} {
  func.func @_tst_encoder_kernel(%arg0: i32, %arg1: memref<2x8x32xf32, #tpu.memory_space<vmem>>, %arg2: memref<1x32x96xbf16, #tpu.memory_space<vmem>>, %arg3: memref<1x1x96xf32, #tpu.memory_space<vmem>>, %arg4: memref<1x32x32xbf16, #tpu.memory_space<vmem>>, %arg5: memref<1x1x32xf32, #tpu.memory_space<vmem>>, %arg6: memref<1x8x1xf32, #tpu.memory_space<vmem>>, %arg7: memref<1x8x1xf32, #tpu.memory_space<vmem>>, %arg8: memref<1x32x64xbf16, #tpu.memory_space<vmem>>, %arg9: memref<1x1x64xf32, #tpu.memory_space<vmem>>, %arg10: memref<1x64x32xbf16, #tpu.memory_space<vmem>>, %arg11: memref<1x1x32xf32, #tpu.memory_space<vmem>>, %arg12: memref<1x8x1xf32, #tpu.memory_space<vmem>>, %arg13: memref<1x8x1xf32, #tpu.memory_space<vmem>>, %arg14: memref<2x8x32xf32, #tpu.memory_space<vmem>>, %arg15: memref<2x8x32xf32, #tpu.memory_space<vmem>>) attributes {dimension_semantics = [#tpu.dimension_semantics<arbitrary>], iteration_bounds = array<i64: 2>, scalar_prefetch = 0 : i64, scratch_operands = 1 : i64, tpu.core_type = #tpu.core_type<tc>, window_params = [{pipeline_mode = #tpu.pipeline_mode<synchronous>, transform_indices = @transform_0, window_bounds = array<i64: 2, 8, 32>}, {transform_indices = @transform_1, window_bounds = array<i64: 1, 32, 96>}, {transform_indices = @transform_2, window_bounds = array<i64: 1, 1, 96>}, {transform_indices = @transform_3, window_bounds = array<i64: 1, 32, 32>}, {transform_indices = @transform_4, window_bounds = array<i64: 1, 1, 32>}, {transform_indices = @transform_5, window_bounds = array<i64: 1, 8, 1>}, {transform_indices = @transform_6, window_bounds = array<i64: 1, 8, 1>}, {transform_indices = @transform_7, window_bounds = array<i64: 1, 32, 64>}, {transform_indices = @transform_8, window_bounds = array<i64: 1, 1, 64>}, {transform_indices = @transform_9, window_bounds = array<i64: 1, 64, 32>}, {transform_indices = @transform_10, window_bounds = array<i64: 1, 1, 32>}, {transform_indices = @transform_11, window_bounds = array<i64: 1, 8, 1>}, {transform_indices = @transform_12, window_bounds = array<i64: 1, 8, 1>}, {pipeline_mode = #tpu.pipeline_mode<synchronous>, transform_indices = @transform_13, window_bounds = array<i64: 2, 8, 32>}]} {
    %c0_i32 = arith.constant 0 : i32
    %0 = arith.cmpi eq, %arg0, %c0_i32 : i32
    %1 = arith.extui %0 : i1 to i32
    %c0_i32_0 = arith.constant 0 : i32
    %2 = arith.cmpi ne, %1, %c0_i32_0 : i32
    scf.if %2 {
      %c0_80 = arith.constant 0 : index
      %c0_81 = arith.constant 0 : index
      %c0_82 = arith.constant 0 : index
      %203 = vector.load %arg1[%c0_80, %c0_81, %c0_82] : memref<2x8x32xf32, #tpu.memory_space<vmem>>, vector<2x8x32xf32>
      %c0_83 = arith.constant 0 : index
      %c0_84 = arith.constant 0 : index
      %c0_85 = arith.constant 0 : index
      %204 = vector.load %arg15[%c0_83, %c0_84, %c0_85] : memref<2x8x32xf32, #tpu.memory_space<vmem>>, vector<2x8x32xf32>
      tpu.vector_store %arg15[%c0_83, %c0_84, %c0_85], %203 {strides = array<i32>} : memref<2x8x32xf32, #tpu.memory_space<vmem>>, vector<2x8x32xf32>,
    } else {
    }
    %c0 = arith.constant 0 : index
    %c0_1 = arith.constant 0 : index
    %c0_2 = arith.constant 0 : index
    %3 = vector.load %arg2[%c0, %c0_1, %c0_2] : memref<1x32x96xbf16, #tpu.memory_space<vmem>>, vector<1x32x96xbf16>
    %4 = vector.shape_cast %3 : vector<1x32x96xbf16> to vector<32x96xbf16>
    %c0_3 = arith.constant 0 : index
    %c0_4 = arith.constant 0 : index
    %c0_5 = arith.constant 0 : index
    %5 = vector.load %arg3[%c0_3, %c0_4, %c0_5] : memref<1x1x96xf32, #tpu.memory_space<vmem>>, vector<1x1x96xf32>
    %6 = vector.shape_cast %5 : vector<1x1x96xf32> to vector<1x96xf32>
    %c0_6 = arith.constant 0 : index
    %c0_7 = arith.constant 0 : index
    %c0_8 = arith.constant 0 : index
    %7 = vector.load %arg4[%c0_6, %c0_7, %c0_8] : memref<1x32x32xbf16, #tpu.memory_space<vmem>>, vector<1x32x32xbf16>
    %8 = vector.shape_cast %7 : vector<1x32x32xbf16> to vector<32x32xbf16>
    %c0_9 = arith.constant 0 : index
    %c0_10 = arith.constant 0 : index
    %c0_11 = arith.constant 0 : index
    %9 = vector.load %arg5[%c0_9, %c0_10, %c0_11] : memref<1x1x32xf32, #tpu.memory_space<vmem>>, vector<1x1x32xf32>
    %10 = vector.shape_cast %9 : vector<1x1x32xf32> to vector<1x32xf32>
    %c0_12 = arith.constant 0 : index
    %c0_13 = arith.constant 0 : index
    %c0_14 = arith.constant 0 : index
    %11 = vector.load %arg6[%c0_12, %c0_13, %c0_14] : memref<1x8x1xf32, #tpu.memory_space<vmem>>, vector<1x8x1xf32>
    %12 = vector.shape_cast %11 : vector<1x8x1xf32> to vector<8x1xf32>
    %c0_15 = arith.constant 0 : index
    %c0_16 = arith.constant 0 : index
    %c0_17 = arith.constant 0 : index
    %13 = vector.load %arg7[%c0_15, %c0_16, %c0_17] : memref<1x8x1xf32, #tpu.memory_space<vmem>>, vector<1x8x1xf32>
    %14 = vector.shape_cast %13 : vector<1x8x1xf32> to vector<8x1xf32>
    %c0_18 = arith.constant 0 : index
    %c0_19 = arith.constant 0 : index
    %c0_20 = arith.constant 0 : index
    %15 = vector.load %arg8[%c0_18, %c0_19, %c0_20] : memref<1x32x64xbf16, #tpu.memory_space<vmem>>, vector<1x32x64xbf16>
    %16 = vector.shape_cast %15 : vector<1x32x64xbf16> to vector<32x64xbf16>
    %c0_21 = arith.constant 0 : index
    %c0_22 = arith.constant 0 : index
    %c0_23 = arith.constant 0 : index
    %17 = vector.load %arg9[%c0_21, %c0_22, %c0_23] : memref<1x1x64xf32, #tpu.memory_space<vmem>>, vector<1x1x64xf32>
    %18 = vector.shape_cast %17 : vector<1x1x64xf32> to vector<1x64xf32>
    %c0_24 = arith.constant 0 : index
    %c0_25 = arith.constant 0 : index
    %c0_26 = arith.constant 0 : index
    %19 = vector.load %arg10[%c0_24, %c0_25, %c0_26] : memref<1x64x32xbf16, #tpu.memory_space<vmem>>, vector<1x64x32xbf16>
    %20 = vector.shape_cast %19 : vector<1x64x32xbf16> to vector<64x32xbf16>
    %c0_27 = arith.constant 0 : index
    %c0_28 = arith.constant 0 : index
    %c0_29 = arith.constant 0 : index
    %21 = vector.load %arg11[%c0_27, %c0_28, %c0_29] : memref<1x1x32xf32, #tpu.memory_space<vmem>>, vector<1x1x32xf32>
    %22 = vector.shape_cast %21 : vector<1x1x32xf32> to vector<1x32xf32>
    %c0_30 = arith.constant 0 : index
    %c0_31 = arith.constant 0 : index
    %c0_32 = arith.constant 0 : index
    %23 = vector.load %arg12[%c0_30, %c0_31, %c0_32] : memref<1x8x1xf32, #tpu.memory_space<vmem>>, vector<1x8x1xf32>
    %24 = vector.shape_cast %23 : vector<1x8x1xf32> to vector<8x1xf32>
    %c0_33 = arith.constant 0 : index
    %c0_34 = arith.constant 0 : index
    %c0_35 = arith.constant 0 : index
    %25 = vector.load %arg13[%c0_33, %c0_34, %c0_35] : memref<1x8x1xf32, #tpu.memory_space<vmem>>, vector<1x8x1xf32>
    %26 = vector.shape_cast %25 : vector<1x8x1xf32> to vector<8x1xf32>
    %c0_36 = arith.constant 0 : index
    %c0_37 = arith.constant 0 : index
    %c0_38 = arith.constant 0 : index
    %27 = vector.load %arg15[%c0_36, %c0_37, %c0_38] : memref<2x8x32xf32, #tpu.memory_space<vmem>>, vector<2x8x32xf32>
    %28 = vector.shape_cast %27 : vector<2x8x32xf32> to vector<16x32xf32>
    %29 = arith.truncf %28 : vector<16x32xf32> to vector<16x32xbf16>
    %cst = arith.constant dense<0.000000e+00> : vector<16x96xf32>
    %30 = tpu.matmul %29, %4, %cst {dimension_numbers = #tpu.dot_dimension_numbers<[1], [0], [0], [1], [0, 0, 1, 1], [], []>} : vector<16x32xbf16>, vector<32x96xbf16>, vector<16x96xf32> -> vector<16x96xf32>
    %31 = vector.broadcast %6 : vector<1x96xf32> to vector<16x96xf32>
    %32 = arith.addf %30, %31 : vector<16x96xf32>
    %33 = vector.extract_strided_slice %32 {offsets = [0, 0], sizes = [16, 32], strides = [1, 1]} : vector<16x96xf32> to vector<16x32xf32>
    %34 = vector.shape_cast %33 : vector<16x32xf32> to vector<2x8x32xf32>
    %35 = vector.extract_strided_slice %32 {offsets = [0, 32], sizes = [16, 32], strides = [1, 1]} : vector<16x96xf32> to vector<16x32xf32>
    %36 = vector.shape_cast %35 : vector<16x32xf32> to vector<2x8x32xf32>
    %37 = vector.extract_strided_slice %32 {offsets = [0, 64], sizes = [16, 32], strides = [1, 1]} : vector<16x96xf32> to vector<16x32xf32>
    %38 = vector.shape_cast %37 : vector<16x32xf32> to vector<2x8x32xf32>
    %39 = vector.extract_strided_slice %34 {offsets = [0, 0, 0], sizes = [2, 8, 8], strides = [1, 1, 1]} : vector<2x8x32xf32> to vector<2x8x8xf32>
    %40 = arith.truncf %39 : vector<2x8x8xf32> to vector<2x8x8xbf16>
    %41 = vector.extract_strided_slice %36 {offsets = [0, 0, 0], sizes = [2, 8, 8], strides = [1, 1, 1]} : vector<2x8x32xf32> to vector<2x8x8xf32>
    %42 = arith.truncf %41 : vector<2x8x8xf32> to vector<2x8x8xbf16>
    %43 = vector.extract_strided_slice %38 {offsets = [0, 0, 0], sizes = [2, 8, 8], strides = [1, 1, 1]} : vector<2x8x32xf32> to vector<2x8x8xf32>
    %44 = arith.truncf %43 : vector<2x8x8xf32> to vector<2x8x8xbf16>
    "tpu.trace_start"() <{level = 10 : i32, message = "bld,bmd->blm"}> : () -> ()
    %cst_39 = arith.constant dense<0.000000e+00> : vector<2x8x8xf32>
    %45 = tpu.matmul %40, %42, %cst_39 {dimension_numbers = #tpu.dot_dimension_numbers<[2], [2], [1], [1], [0, 0, 0, 1, 1, 1], [0], [0]>} : vector<2x8x8xbf16>, vector<2x8x8xbf16>, vector<2x8x8xf32> -> vector<2x8x8xf32>
    "tpu.trace_stop"() : () -> ()
    %cst_40 = arith.constant dense<0xFF800000> : vector<2x8xf32>
    %46 = vector.multi_reduction <maximumf>, %45, %cst_40 [2] : vector<2x8x8xf32> to vector<2x8xf32>
    %47 = vector.shape_cast %46 : vector<2x8xf32> to vector<2x8x1xf32>
    %48 = vector.broadcast %47 : vector<2x8x1xf32> to vector<2x8x8xf32>
    %49 = arith.subf %45, %48 : vector<2x8x8xf32>
    %50 = math.exp %49 : vector<2x8x8xf32>
    %cst_41 = arith.constant dense<0.000000e+00> : vector<2x8xf32>
    %51 = vector.multi_reduction <add>, %50, %cst_41 [2] : vector<2x8x8xf32> to vector<2x8xf32>
    %52 = vector.shape_cast %51 : vector<2x8xf32> to vector<2x8x1xf32>
    %53 = tpu.reciprocal %52 {approx = true} : vector<2x8x1xf32> -> vector<2x8x1xf32>
    %54 = vector.broadcast %53 : vector<2x8x1xf32> to vector<2x8x8xf32>
    %55 = arith.mulf %50, %54 : vector<2x8x8xf32>
    %56 = arith.truncf %55 : vector<2x8x8xf32> to vector<2x8x8xbf16>
    "tpu.trace_start"() <{level = 10 : i32, message = "blm,bmd->bld"}> : () -> ()
    %cst_42 = arith.constant dense<0.000000e+00> : vector<2x8x8xf32>
    %57 = tpu.matmul %56, %44, %cst_42 {dimension_numbers = #tpu.dot_dimension_numbers<[2], [1], [1], [2], [0, 0, 0, 1, 1, 2], [0], [0]>} : vector<2x8x8xbf16>, vector<2x8x8xbf16>, vector<2x8x8xf32> -> vector<2x8x8xf32>
    "tpu.trace_stop"() : () -> ()
    %58 = vector.extract_strided_slice %34 {offsets = [0, 0, 8], sizes = [2, 8, 8], strides = [1, 1, 1]} : vector<2x8x32xf32> to vector<2x8x8xf32>
    %59 = arith.truncf %58 : vector<2x8x8xf32> to vector<2x8x8xbf16>
    %60 = vector.extract_strided_slice %36 {offsets = [0, 0, 8], sizes = [2, 8, 8], strides = [1, 1, 1]} : vector<2x8x32xf32> to vector<2x8x8xf32>
    %61 = arith.truncf %60 : vector<2x8x8xf32> to vector<2x8x8xbf16>
    %62 = vector.extract_strided_slice %38 {offsets = [0, 0, 8], sizes = [2, 8, 8], strides = [1, 1, 1]} : vector<2x8x32xf32> to vector<2x8x8xf32>
    %63 = arith.truncf %62 : vector<2x8x8xf32> to vector<2x8x8xbf16>
    "tpu.trace_start"() <{level = 10 : i32, message = "bld,bmd->blm"}> : () -> ()
    %cst_43 = arith.constant dense<0.000000e+00> : vector<2x8x8xf32>
    %64 = tpu.matmul %59, %61, %cst_43 {dimension_numbers = #tpu.dot_dimension_numbers<[2], [2], [1], [1], [0, 0, 0, 1, 1, 1], [0], [0]>} : vector<2x8x8xbf16>, vector<2x8x8xbf16>, vector<2x8x8xf32> -> vector<2x8x8xf32>
    "tpu.trace_stop"() : () -> ()
    %cst_44 = arith.constant dense<0xFF800000> : vector<2x8xf32>
    %65 = vector.multi_reduction <maximumf>, %64, %cst_44 [2] : vector<2x8x8xf32> to vector<2x8xf32>
    %66 = vector.shape_cast %65 : vector<2x8xf32> to vector<2x8x1xf32>
    %67 = vector.broadcast %66 : vector<2x8x1xf32> to vector<2x8x8xf32>
    %68 = arith.subf %64, %67 : vector<2x8x8xf32>
    %69 = math.exp %68 : vector<2x8x8xf32>
    %cst_45 = arith.constant dense<0.000000e+00> : vector<2x8xf32>
    %70 = vector.multi_reduction <add>, %69, %cst_45 [2] : vector<2x8x8xf32> to vector<2x8xf32>
    %71 = vector.shape_cast %70 : vector<2x8xf32> to vector<2x8x1xf32>
    %72 = tpu.reciprocal %71 {approx = true} : vector<2x8x1xf32> -> vector<2x8x1xf32>
    %73 = vector.broadcast %72 : vector<2x8x1xf32> to vector<2x8x8xf32>
    %74 = arith.mulf %69, %73 : vector<2x8x8xf32>
    %75 = arith.truncf %74 : vector<2x8x8xf32> to vector<2x8x8xbf16>
    "tpu.trace_start"() <{level = 10 : i32, message = "blm,bmd->bld"}> : () -> ()
    %cst_46 = arith.constant dense<0.000000e+00> : vector<2x8x8xf32>
    %76 = tpu.matmul %75, %63, %cst_46 {dimension_numbers = #tpu.dot_dimension_numbers<[2], [1], [1], [2], [0, 0, 0, 1, 1, 2], [0], [0]>} : vector<2x8x8xbf16>, vector<2x8x8xbf16>, vector<2x8x8xf32> -> vector<2x8x8xf32>
    "tpu.trace_stop"() : () -> ()
    %77 = vector.extract_strided_slice %34 {offsets = [0, 0, 16], sizes = [2, 8, 8], strides = [1, 1, 1]} : vector<2x8x32xf32> to vector<2x8x8xf32>
    %78 = arith.truncf %77 : vector<2x8x8xf32> to vector<2x8x8xbf16>
    %79 = vector.extract_strided_slice %36 {offsets = [0, 0, 16], sizes = [2, 8, 8], strides = [1, 1, 1]} : vector<2x8x32xf32> to vector<2x8x8xf32>
    %80 = arith.truncf %79 : vector<2x8x8xf32> to vector<2x8x8xbf16>
    %81 = vector.extract_strided_slice %38 {offsets = [0, 0, 16], sizes = [2, 8, 8], strides = [1, 1, 1]} : vector<2x8x32xf32> to vector<2x8x8xf32>
    %82 = arith.truncf %81 : vector<2x8x8xf32> to vector<2x8x8xbf16>
    "tpu.trace_start"() <{level = 10 : i32, message = "bld,bmd->blm"}> : () -> ()
    %cst_47 = arith.constant dense<0.000000e+00> : vector<2x8x8xf32>
    %83 = tpu.matmul %78, %80, %cst_47 {dimension_numbers = #tpu.dot_dimension_numbers<[2], [2], [1], [1], [0, 0, 0, 1, 1, 1], [0], [0]>} : vector<2x8x8xbf16>, vector<2x8x8xbf16>, vector<2x8x8xf32> -> vector<2x8x8xf32>
    "tpu.trace_stop"() : () -> ()
    %cst_48 = arith.constant dense<0xFF800000> : vector<2x8xf32>
    %84 = vector.multi_reduction <maximumf>, %83, %cst_48 [2] : vector<2x8x8xf32> to vector<2x8xf32>
    %85 = vector.shape_cast %84 : vector<2x8xf32> to vector<2x8x1xf32>
    %86 = vector.broadcast %85 : vector<2x8x1xf32> to vector<2x8x8xf32>
    %87 = arith.subf %83, %86 : vector<2x8x8xf32>
    %88 = math.exp %87 : vector<2x8x8xf32>
    %cst_49 = arith.constant dense<0.000000e+00> : vector<2x8xf32>
    %89 = vector.multi_reduction <add>, %88, %cst_49 [2] : vector<2x8x8xf32> to vector<2x8xf32>
    %90 = vector.shape_cast %89 : vector<2x8xf32> to vector<2x8x1xf32>
    %91 = tpu.reciprocal %90 {approx = true} : vector<2x8x1xf32> -> vector<2x8x1xf32>
    %92 = vector.broadcast %91 : vector<2x8x1xf32> to vector<2x8x8xf32>
    %93 = arith.mulf %88, %92 : vector<2x8x8xf32>
    %94 = arith.truncf %93 : vector<2x8x8xf32> to vector<2x8x8xbf16>
    "tpu.trace_start"() <{level = 10 : i32, message = "blm,bmd->bld"}> : () -> ()
    %cst_50 = arith.constant dense<0.000000e+00> : vector<2x8x8xf32>
    %95 = tpu.matmul %94, %82, %cst_50 {dimension_numbers = #tpu.dot_dimension_numbers<[2], [1], [1], [2], [0, 0, 0, 1, 1, 2], [0], [0]>} : vector<2x8x8xbf16>, vector<2x8x8xbf16>, vector<2x8x8xf32> -> vector<2x8x8xf32>
    "tpu.trace_stop"() : () -> ()
    %96 = vector.extract_strided_slice %34 {offsets = [0, 0, 24], sizes = [2, 8, 8], strides = [1, 1, 1]} : vector<2x8x32xf32> to vector<2x8x8xf32>
    %97 = arith.truncf %96 : vector<2x8x8xf32> to vector<2x8x8xbf16>
    %98 = vector.extract_strided_slice %36 {offsets = [0, 0, 24], sizes = [2, 8, 8], strides = [1, 1, 1]} : vector<2x8x32xf32> to vector<2x8x8xf32>
    %99 = arith.truncf %98 : vector<2x8x8xf32> to vector<2x8x8xbf16>
    %100 = vector.extract_strided_slice %38 {offsets = [0, 0, 24], sizes = [2, 8, 8], strides = [1, 1, 1]} : vector<2x8x32xf32> to vector<2x8x8xf32>
    %101 = arith.truncf %100 : vector<2x8x8xf32> to vector<2x8x8xbf16>
    "tpu.trace_start"() <{level = 10 : i32, message = "bld,bmd->blm"}> : () -> ()
    %cst_51 = arith.constant dense<0.000000e+00> : vector<2x8x8xf32>
    %102 = tpu.matmul %97, %99, %cst_51 {dimension_numbers = #tpu.dot_dimension_numbers<[2], [2], [1], [1], [0, 0, 0, 1, 1, 1], [0], [0]>} : vector<2x8x8xbf16>, vector<2x8x8xbf16>, vector<2x8x8xf32> -> vector<2x8x8xf32>
    "tpu.trace_stop"() : () -> ()
    %cst_52 = arith.constant dense<0xFF800000> : vector<2x8xf32>
    %103 = vector.multi_reduction <maximumf>, %102, %cst_52 [2] : vector<2x8x8xf32> to vector<2x8xf32>
    %104 = vector.shape_cast %103 : vector<2x8xf32> to vector<2x8x1xf32>
    %105 = vector.broadcast %104 : vector<2x8x1xf32> to vector<2x8x8xf32>
    %106 = arith.subf %102, %105 : vector<2x8x8xf32>
    %107 = math.exp %106 : vector<2x8x8xf32>
    %cst_53 = arith.constant dense<0.000000e+00> : vector<2x8xf32>
    %108 = vector.multi_reduction <add>, %107, %cst_53 [2] : vector<2x8x8xf32> to vector<2x8xf32>
    %109 = vector.shape_cast %108 : vector<2x8xf32> to vector<2x8x1xf32>
    %110 = tpu.reciprocal %109 {approx = true} : vector<2x8x1xf32> -> vector<2x8x1xf32>
    %111 = vector.broadcast %110 : vector<2x8x1xf32> to vector<2x8x8xf32>
    %112 = arith.mulf %107, %111 : vector<2x8x8xf32>
    %113 = arith.truncf %112 : vector<2x8x8xf32> to vector<2x8x8xbf16>
    "tpu.trace_start"() <{level = 10 : i32, message = "blm,bmd->bld"}> : () -> ()
    %cst_54 = arith.constant dense<0.000000e+00> : vector<2x8x8xf32>
    %114 = tpu.matmul %113, %101, %cst_54 {dimension_numbers = #tpu.dot_dimension_numbers<[2], [1], [1], [2], [0, 0, 0, 1, 1, 2], [0], [0]>} : vector<2x8x8xbf16>, vector<2x8x8xbf16>, vector<2x8x8xf32> -> vector<2x8x8xf32>
    "tpu.trace_stop"() : () -> ()
    %115 = tpu.concatenate %57, %76, %95, %114 in 2 : vector<2x8x8xf32>, vector<2x8x8xf32>, vector<2x8x8xf32>, vector<2x8x8xf32> -> vector<2x8x32xf32>
    %116 = vector.shape_cast %115 : vector<2x8x32xf32> to vector<16x32xf32>
    %117 = arith.truncf %116 : vector<16x32xf32> to vector<16x32xbf16>
    %cst_55 = arith.constant dense<0.000000e+00> : vector<16x32xf32>
    %118 = tpu.matmul %117, %8, %cst_55 {dimension_numbers = #tpu.dot_dimension_numbers<[1], [0], [0], [1], [0, 0, 1, 1], [], []>} : vector<16x32xbf16>, vector<32x32xbf16>, vector<16x32xf32> -> vector<16x32xf32>
    %119 = vector.broadcast %10 : vector<1x32xf32> to vector<16x32xf32>
    %120 = arith.addf %118, %119 : vector<16x32xf32>
    %121 = vector.shape_cast %120 : vector<16x32xf32> to vector<2x8x32xf32>
    %122 = arith.addf %27, %121 : vector<2x8x32xf32>
    %cst_56 = arith.constant dense<0.000000e+00> : vector<2x8xf32>
    %123 = vector.multi_reduction <add>, %122, %cst_56 [2] : vector<2x8x32xf32> to vector<2x8xf32>
    %124 = vector.shape_cast %123 : vector<2x8xf32> to vector<2x8x1xf32>
    %cst_57 = arith.constant dense<0.000000e+00> : vector<8x1xf32>
    %125 = vector.multi_reduction <add>, %124, %cst_57 [0] : vector<2x8x1xf32> to vector<8x1xf32>
    %126 = vector.shape_cast %125 : vector<8x1xf32> to vector<1x8x1xf32>
    %cst_58 = arith.constant 1.562500e-02 : f32
    %127 = vector.broadcast %cst_58 : f32 to vector<1x8x1xf32>
    %128 = arith.mulf %126, %127 : vector<1x8x1xf32>
    %129 = vector.broadcast %128 : vector<1x8x1xf32> to vector<2x8x32xf32>
    %130 = arith.subf %122, %129 : vector<2x8x32xf32>
    %131 = arith.mulf %130, %130 : vector<2x8x32xf32>
    %cst_59 = arith.constant dense<0.000000e+00> : vector<2x8xf32>
    %132 = vector.multi_reduction <add>, %131, %cst_59 [2] : vector<2x8x32xf32> to vector<2x8xf32>
    %133 = vector.shape_cast %132 : vector<2x8xf32> to vector<2x8x1xf32>
    %cst_60 = arith.constant dense<0.000000e+00> : vector<8x1xf32>
    %134 = vector.multi_reduction <add>, %133, %cst_60 [0] : vector<2x8x1xf32> to vector<8x1xf32>
    %135 = vector.shape_cast %134 : vector<8x1xf32> to vector<1x8x1xf32>
    %cst_61 = arith.constant 1.562500e-02 : f32
    %136 = vector.broadcast %cst_61 : f32 to vector<1x8x1xf32>
    %137 = arith.mulf %135, %136 : vector<1x8x1xf32>
    %cst_62 = arith.constant 9.99999974E-6 : f32
    %138 = vector.broadcast %cst_62 : f32 to vector<1x8x1xf32>
    %139 = arith.addf %137, %138 : vector<1x8x1xf32>
    %140 = math.rsqrt %139 : vector<1x8x1xf32>
    %141 = vector.broadcast %140 : vector<1x8x1xf32> to vector<2x8x32xf32>
    %142 = arith.mulf %130, %141 : vector<2x8x32xf32>
    %143 = vector.shape_cast %12 : vector<8x1xf32> to vector<1x8x1xf32>
    %144 = vector.broadcast %143 : vector<1x8x1xf32> to vector<2x8x32xf32>
    %145 = arith.mulf %142, %144 : vector<2x8x32xf32>
    %146 = vector.shape_cast %14 : vector<8x1xf32> to vector<1x8x1xf32>
    %147 = vector.broadcast %146 : vector<1x8x1xf32> to vector<2x8x32xf32>
    %148 = arith.addf %145, %147 : vector<2x8x32xf32>
    %149 = vector.shape_cast %148 : vector<2x8x32xf32> to vector<16x32xf32>
    %150 = arith.truncf %149 : vector<16x32xf32> to vector<16x32xbf16>
    %cst_63 = arith.constant dense<0.000000e+00> : vector<16x64xf32>
    %151 = tpu.matmul %150, %16, %cst_63 {dimension_numbers = #tpu.dot_dimension_numbers<[1], [0], [0], [1], [0, 0, 1, 1], [], []>} : vector<16x32xbf16>, vector<32x64xbf16>, vector<16x64xf32> -> vector<16x64xf32>
    %152 = vector.broadcast %18 : vector<1x64xf32> to vector<16x64xf32>
    %153 = arith.addf %151, %152 : vector<16x64xf32>
    %cst_64 = arith.constant 5.000000e-01 : f32
    %154 = vector.broadcast %cst_64 : f32 to vector<16x64xf32>
    %155 = arith.mulf %154, %153 : vector<16x64xf32>
    %cst_65 = arith.constant 4.471500e-02 : f32
    %156 = vector.broadcast %cst_65 : f32 to vector<16x64xf32>
    %157 = arith.mulf %156, %153 : vector<16x64xf32>
    %158 = arith.mulf %157, %153 : vector<16x64xf32>
    %159 = arith.mulf %158, %153 : vector<16x64xf32>
    %160 = arith.addf %153, %159 : vector<16x64xf32>
    %cst_66 = arith.constant 0.797884583 : f32
    %161 = vector.broadcast %cst_66 : f32 to vector<16x64xf32>
    %162 = arith.mulf %161, %160 : vector<16x64xf32>
    %163 = math.tanh %162 : vector<16x64xf32>
    %cst_67 = arith.constant 1.000000e+00 : f32
    %164 = vector.broadcast %cst_67 : f32 to vector<16x64xf32>
    %165 = arith.addf %164, %163 : vector<16x64xf32>
    %166 = arith.mulf %155, %165 : vector<16x64xf32>
    %167 = arith.truncf %166 : vector<16x64xf32> to vector<16x64xbf16>
    %cst_68 = arith.constant dense<0.000000e+00> : vector<16x32xf32>
    %168 = tpu.matmul %167, %20, %cst_68 {dimension_numbers = #tpu.dot_dimension_numbers<[1], [0], [0], [1], [0, 0, 1, 1], [], []>} : vector<16x64xbf16>, vector<64x32xbf16>, vector<16x32xf32> -> vector<16x32xf32>
    %169 = vector.broadcast %22 : vector<1x32xf32> to vector<16x32xf32>
    %170 = arith.addf %168, %169 : vector<16x32xf32>
    %171 = vector.shape_cast %170 : vector<16x32xf32> to vector<2x8x32xf32>
    %172 = arith.addf %148, %171 : vector<2x8x32xf32>
    %cst_69 = arith.constant dense<0.000000e+00> : vector<2x8xf32>
    %173 = vector.multi_reduction <add>, %172, %cst_69 [2] : vector<2x8x32xf32> to vector<2x8xf32>
    %174 = vector.shape_cast %173 : vector<2x8xf32> to vector<2x8x1xf32>
    %cst_70 = arith.constant dense<0.000000e+00> : vector<8x1xf32>
    %175 = vector.multi_reduction <add>, %174, %cst_70 [0] : vector<2x8x1xf32> to vector<8x1xf32>
    %176 = vector.shape_cast %175 : vector<8x1xf32> to vector<1x8x1xf32>
    %cst_71 = arith.constant 1.562500e-02 : f32
    %177 = vector.broadcast %cst_71 : f32 to vector<1x8x1xf32>
    %178 = arith.mulf %176, %177 : vector<1x8x1xf32>
    %179 = vector.broadcast %178 : vector<1x8x1xf32> to vector<2x8x32xf32>
    %180 = arith.subf %172, %179 : vector<2x8x32xf32>
    %181 = arith.mulf %180, %180 : vector<2x8x32xf32>
    %cst_72 = arith.constant dense<0.000000e+00> : vector<2x8xf32>
    %182 = vector.multi_reduction <add>, %181, %cst_72 [2] : vector<2x8x32xf32> to vector<2x8xf32>
    %183 = vector.shape_cast %182 : vector<2x8xf32> to vector<2x8x1xf32>
    %cst_73 = arith.constant dense<0.000000e+00> : vector<8x1xf32>
    %184 = vector.multi_reduction <add>, %183, %cst_73 [0] : vector<2x8x1xf32> to vector<8x1xf32>
    %185 = vector.shape_cast %184 : vector<8x1xf32> to vector<1x8x1xf32>
    %cst_74 = arith.constant 1.562500e-02 : f32
    %186 = vector.broadcast %cst_74 : f32 to vector<1x8x1xf32>
    %187 = arith.mulf %185, %186 : vector<1x8x1xf32>
    %cst_75 = arith.constant 9.99999974E-6 : f32
    %188 = vector.broadcast %cst_75 : f32 to vector<1x8x1xf32>
    %189 = arith.addf %187, %188 : vector<1x8x1xf32>
    %190 = math.rsqrt %189 : vector<1x8x1xf32>
    %191 = vector.broadcast %190 : vector<1x8x1xf32> to vector<2x8x32xf32>
    %192 = arith.mulf %180, %191 : vector<2x8x32xf32>
    %193 = vector.shape_cast %24 : vector<8x1xf32> to vector<1x8x1xf32>
    %194 = vector.broadcast %193 : vector<1x8x1xf32> to vector<2x8x32xf32>
    %195 = arith.mulf %192, %194 : vector<2x8x32xf32>
    %196 = vector.shape_cast %26 : vector<8x1xf32> to vector<1x8x1xf32>
    %197 = vector.broadcast %196 : vector<1x8x1xf32> to vector<2x8x32xf32>
    %198 = arith.addf %195, %197 : vector<2x8x32xf32>
    %c0_76 = arith.constant 0 : index
    %c0_77 = arith.constant 0 : index
    %c0_78 = arith.constant 0 : index
    %199 = vector.load %arg15[%c0_76, %c0_77, %c0_78] : memref<2x8x32xf32, #tpu.memory_space<vmem>>, vector<2x8x32xf32>
    tpu.vector_store %arg15[%c0_76, %c0_77, %c0_78], %198 {strides = array<i32>} : memref<2x8x32xf32, #tpu.memory_space<vmem>>, vector<2x8x32xf32>,
    %c1_i32 = arith.constant 1 : i32
    %200 = arith.cmpi eq, %arg0, %c1_i32 : i32
    %201 = arith.extui %200 : i1 to i32
    %c0_i32_79 = arith.constant 0 : i32
    %202 = arith.cmpi ne, %201, %c0_i32_79 : i32
    scf.if %202 {
      %c0_80 = arith.constant 0 : index
      %c0_81 = arith.constant 0 : index
      %c0_82 = arith.constant 0 : index
      %203 = vector.load %arg15[%c0_80, %c0_81, %c0_82] : memref<2x8x32xf32, #tpu.memory_space<vmem>>, vector<2x8x32xf32>
      %c0_83 = arith.constant 0 : index
      %c0_84 = arith.constant 0 : index
      %c0_85 = arith.constant 0 : index
      %204 = vector.load %arg14[%c0_83, %c0_84, %c0_85] : memref<2x8x32xf32, #tpu.memory_space<vmem>>, vector<2x8x32xf32>
      tpu.vector_store %arg14[%c0_83, %c0_84, %c0_85], %203 {strides = array<i32>} : memref<2x8x32xf32, #tpu.memory_space<vmem>>, vector<2x8x32xf32>,
    } else {
    }
    return
  }
  func.func @transform_0(%arg0: i32) -> (i32, i32, i32) {
    %c0_i32 = arith.constant 0 : i32
    %c0_i32_0 = arith.constant 0 : i32
    %c0_i32_1 = arith.constant 0 : i32
    %c0_i32_2 = arith.constant 0 : i32
    return %c0_i32, %c0_i32_0, %c0_i32_1 : i32, i32, i32
  }
  func.func @transform_1(%arg0: i32) -> (i32, i32, i32) {
    %c0_i32 = arith.constant 0 : i32
    %c0_i32_0 = arith.constant 0 : i32
    %c0_i32_1 = arith.constant 0 : i32
    return %arg0, %c0_i32, %c0_i32_0 : i32, i32, i32
  }
  func.func @transform_2(%arg0: i32) -> (i32, i32, i32) {
    %c0_i32 = arith.constant 0 : i32
    %c0_i32_0 = arith.constant 0 : i32
    %c0_i32_1 = arith.constant 0 : i32
    return %arg0, %c0_i32, %c0_i32_0 : i32, i32, i32
  }
  func.func @transform_3(%arg0: i32) -> (i32, i32, i32) {
    %c0_i32 = arith.constant 0 : i32
    %c0_i32_0 = arith.constant 0 : i32
    %c0_i32_1 = arith.constant 0 : i32
    return %arg0, %c0_i32, %c0_i32_0 : i32, i32, i32
  }
  func.func @transform_4(%arg0: i32) -> (i32, i32, i32) {
    %c0_i32 = arith.constant 0 : i32
    %c0_i32_0 = arith.constant 0 : i32
    %c0_i32_1 = arith.constant 0 : i32
    return %arg0, %c0_i32, %c0_i32_0 : i32, i32, i32
  }
  func.func @transform_5(%arg0: i32) -> (i32, i32, i32) {
    %c0_i32 = arith.constant 0 : i32
    %c0_i32_0 = arith.constant 0 : i32
    %c0_i32_1 = arith.constant 0 : i32
    return %arg0, %c0_i32, %c0_i32_0 : i32, i32, i32
  }
  func.func @transform_6(%arg0: i32) -> (i32, i32, i32) {
    %c0_i32 = arith.constant 0 : i32
    %c0_i32_0 = arith.constant 0 : i32
    %c0_i32_1 = arith.constant 0 : i32
    return %arg0, %c0_i32, %c0_i32_0 : i32, i32, i32
  }
  func.func @transform_7(%arg0: i32) -> (i32, i32, i32) {
    %c0_i32 = arith.constant 0 : i32
    %c0_i32_0 = arith.constant 0 : i32
    %c0_i32_1 = arith.constant 0 : i32
    return %arg0, %c0_i32, %c0_i32_0 : i32, i32, i32
  }
  func.func @transform_8(%arg0: i32) -> (i32, i32, i32) {
    %c0_i32 = arith.constant 0 : i32
    %c0_i32_0 = arith.constant 0 : i32
    %c0_i32_1 = arith.constant 0 : i32
    return %arg0, %c0_i32, %c0_i32_0 : i32, i32, i32
  }
  func.func @transform_9(%arg0: i32) -> (i32, i32, i32) {
    %c0_i32 = arith.constant 0 : i32
    %c0_i32_0 = arith.constant 0 : i32
    %c0_i32_1 = arith.constant 0 : i32
    return %arg0, %c0_i32, %c0_i32_0 : i32, i32, i32
  }
  func.func @transform_10(%arg0: i32) -> (i32, i32, i32) {
    %c0_i32 = arith.constant 0 : i32
    %c0_i32_0 = arith.constant 0 : i32
    %c0_i32_1 = arith.constant 0 : i32
    return %arg0, %c0_i32, %c0_i32_0 : i32, i32, i32
  }
  func.func @transform_11(%arg0: i32) -> (i32, i32, i32) {
    %c0_i32 = arith.constant 0 : i32
    %c0_i32_0 = arith.constant 0 : i32
    %c0_i32_1 = arith.constant 0 : i32
    return %arg0, %c0_i32, %c0_i32_0 : i32, i32, i32
  }
  func.func @transform_12(%arg0: i32) -> (i32, i32, i32) {
    %c0_i32 = arith.constant 0 : i32
    %c0_i32_0 = arith.constant 0 : i32
    %c0_i32_1 = arith.constant 0 : i32
    return %arg0, %c0_i32, %c0_i32_0 : i32, i32, i32
  }
  func.func @transform_13(%arg0: i32) -> (i32, i32, i32) {
    %c0_i32 = arith.constant 0 : i32
    %c0_i32_0 = arith.constant 0 : i32
    %c0_i32_1 = arith.constant 0 : i32
    %c0_i32_2 = arith.constant 0 : i32
    return %c0_i32, %c0_i32_0, %c0_i32_1 : i32, i32, i32
  }
}

</mosaic_0001>

<bundles_post_ra>
// kernel: tpu_custom_call.1
= control target key start
LH: loop header
LB: loop body
LE: loop exit
PB: predicated region body
PF: predicated region fallthrough
CT: control target
= control target key end

     0   :  { %s2160_s0 = inlined_call_operand.vmem [shape: f32[2,8,32], index: 0, kind: input, shape index: {}]   ;;  %s2161_s1 = inlined_call_operand.vmem [shape: bf16[2,32,96], index: 1, kind: input, shape index: {}]   ;;  %s2162_s2 = inlined_call_operand.vmem [shape: f32[2,1,96], index: 2, kind: input, shape index: {}]   ;;  %s2163_s3 = inlined_call_operand.vmem [shape: bf16[2,32,32], index: 3, kind: input, shape index: {}]   ;;  %s2164_s4 = inlined_call_operand.vmem [shape: f32[2,1,32], index: 4, kind: input, shape index: {}]   ;;  %s2165_s5 = inlined_call_operand.vmem [shape: f32[2,8,1], index: 5, kind: input, shape index: {}]   ;;  %s2166_s6 = inlined_call_operand.vmem [shape: f32[2,8,1], index: 6, kind: input, shape index: {}]   ;;  %s2167_s7 = inlined_call_operand.vmem [shape: bf16[2,32,64], index: 7, kind: input, shape index: {}]   ;;  %s2168_s8 = inlined_call_operand.vmem [shape: f32[2,1,64], index: 8, kind: input, shape index: {}]   ;;  %s2169_s9 = inlined_call_operand.vmem [shape: bf16[2,64,32], index: 9, kind: input, shape index: {}]   ;;  %s2170_s10 = inlined_call_operand.vmem [shape: f32[2,1,32], index: 10, kind: input, shape index: {}]   ;;  %s2171_s11 = inlined_call_operand.vmem [shape: f32[2,8,1], index: 11, kind: input, shape index: {}]   ;;  %s2172_s12 = inlined_call_operand.vmem [shape: f32[2,8,1], index: 12, kind: input, shape index: {}]   ;;  %s2173_s13 = inlined_call_operand.hbm [shape: f32[2,8,32], index: 13, kind: output, shape index: {}]  }
   0x1   :  { %2175 = sst [smem:[#allocation7_spill]] %s2161_s1 }
   0x2   :  { %2176 = sst [smem:[#allocation8_spill]] %s2163_s3 }
   0x3   :  { %2177 = sst [smem:[#allocation9_spill]] %s2164_s4 }
   0x4   :  { %2178 = sst [smem:[#allocation10_spill]] %s2165_s5 }
   0x5   :  { %2179 = sst [smem:[#allocation11_spill]] %s2173_s13 }
   0x6   :  { %18 = vsyncpa [#allocation4], 0  ;;  %s1895_s25 = smov 0  }
   0x7 LB: > { %2180 = sst [smem:[#allocation6_spill]] %s1806_s25  ;;  %s1901_s26 = sadd.s32 4294967295, %s1806_s25   ;;  %s1806_s25 = sphi %s1895_s25, %s24_s25  }
   0x8   : > { %p1582_p0 = scmp.ge.s32.totalorder %s1806_s25, 1  ;;  %p481_p1 = scmp.lt.s32.totalorder %s1806_s25, 3 }
   0xa   : > { %p482_p2 = pnand %p1582_p0, %p481_p1 }
   0xb   : > { %p563_p3 = scmp.lt.s32.totalorder (!%p482_p2), %s1901_s26, 1  ;;  %s2181_s1 = sld [smem:[#allocation7_spill]] (!%p482_p2) }
   0xc   : > { %485 = sbr.rel (%p482_p2) target bundleno = 2049 (0x801), region = 72  ;;  %s2182_s3 = sld [smem:[#allocation8_spill]] (!%p482_p2) }
   0xd   : > { %p1595_p4 = scmp.ne.s32.totalorder (!%p482_p2), %s1901_s26, 0 }
  0x11   : > { %s1907_s27 = scalar_select %p563_p3, %s1901_s26, 1 }
  0x13   : > { %s1661_s28 = sshll.u32 %s1907_s27, 4  ;;  %s1927_s24 = sshll.u32 %s1907_s27, 3 }
  0x14   : > { %s567_s17 = scalar_lea.vmem %s2181_s1, %s1661_s28  ;;  %s1920_s20 = scalar_lea.vmem %s2182_s3, %s1661_s28 }
  0x15   : > { %s1940_s14 = scalar_lea.vmem %s2167_s7, %s1661_s28  ;;  %s594_s23 = scalar_lea.vmem %s2168_s8, %s1907_s27 }
  0x16   : > { %s1664_s1 = sshll.u32 %s1907_s27, 5  ;;  %s602_s25 = scalar_lea.vmem %s2170_s10, %s1907_s27 }
  0x17   : > { %s1954_s5 = scalar_lea.vmem %s2169_s9, %s1664_s1  ;;  %s606_s18 = scalar_lea.vmem %s2171_s11, %s1927_s24 }
  0x18   : > { %s610_s16 = scalar_lea.vmem %s2172_s12, %s1927_s24  ;;  %615 = sbr.rel (%p1595_p4) target bundleno = 32 (0x20), region = 76 }
  0x1d   : > { %v616_v0 = vld [vmem:[%s2160_s0] sm:$0xff]  ;;  %vm618_vm0 = vcmask 261120   ;;  %v617_v1 = vld [vmem:[%s2160_s0 + $0x8] sm:$0xff] }
  0x1e   : > { %619 = vst.msk [vmem:[#allocation2] sm:$0xff] %vm618_vm0, %v616_v0 }
  0x1f   : > { %620 = vst.msk [vmem:[#allocation2 + $0x8] sm:$0xff] %vm618_vm0, %v617_v1 }
  0x20 PF: > { %v1666_v2 = vld [vmem:[%s567_s17 + $0x8] sm:$0xff]  ;;  %v1665_v3 = vld [vmem:[%s567_s17] sm:$0xff]  ;;  %vm667_vm1 = vcmask 261120   ;;  %s2185_s13 = scalar_lea.vmem %s2162_s2, %s1907_s27  ;;  %s1808_s17 = smov 120   ;;  %vm692_vm2 = vcmask 64512   ;;  %vm765_vm3 = vcmask 1043456  }
  0x21   : > { %677 = vmatpush.bf16.msra.mxu0 %v1666_v2  ;;  %v1724_v7 = vld [vmem:[%s2185_s13] ss:$0 sm:$0xff]  ;;  %s1809_s30 = smov 88   ;;  %s1810_s15 = smov 96   ;;  %vm1165_vm4 = vcmask 130048   ;;  %vm1168_vm5 = vcmask 195584  }
  0x22   : > { %s1811_s28 = smov 112   ;;  %s1812_s19 = smov 80   ;;  %vm1332_vm9 = vcmask 523264  }
  0x23   : > { %s1813_s21 = smov 72   ;;  %s1814_s22 = smov 104  }
  0x24   : > { %s1815_s3 = smov 64   ;;  %s1816_s4 = smov 56  }
  0x25   : > { %v1971_v4 = vld [vmem:[#allocation2] sm:$0xff]  ;;  %678 = vmatpush.bf16.msra.mxu0 %v1665_v3  ;;  %s1817_s1 = smov 48   ;;  %s1818_s29 = smov 40  }
  0x26   : > { %v1973_v5 = vld [vmem:[#allocation2 + $0x8] sm:$0xff]  ;;  %s1819_s13 = smov 8   ;;  %p1656_p5 = scmp.ne.s32.totalorder %s1901_s26, 1 }
  0x27   : > { %v651_v6 = vpack.c.bf16 %v1973_v5, %v1971_v4 }
  0x29   : > { %1604 = vmatmul.msk.bf16.vlgmr.msra.gmra.mxu0 %vm667_vm1, %v651_v6 }
  0xa6   : > { %v680_v8 = vpop.f32.mrf.mxu0 }
  0xa7   : > { %v681_v9 = vadd.f32 %v1724_v7, %v680_v8 }
  0xa9   : > { %v685_v10 = vpack.c.bf16 %v681_v9, %v681_v9 }
  0xab   : > { %v688_v11 = vunpack.c.l.b16 %v685_v10 }
  0xad   : > { %v1983_v12 = vpack.c.b16 %v688_v11, %v688_v11 }
  0xae   : > { %v682_v13 = vpop.f32.mrf.mxu0 }
  0xaf   : > { %v683_v14 = vadd.f32 %v1724_v7, %v682_v13  ;;  %803 = vrot.lane.b32.xlu2 %v1983_v12, %s1808_s17  ;;  %805 = vrot.lane.b32.xlu1 %v1983_v12, %s1809_s30 }
  0xb0   : > { %690 = vrot.lane.b32.xlu0 %v1983_v12, %s1810_s15 }
  0xb1   : > { %v686_v15 = vpack.c.bf16 %v683_v14, %v683_v14 }
  0xb3   : > { %v713_v16 = vunpack.c.l.b16 %v686_v15 }
  0xb5   : > { %v1988_v17 = vpack.c.b16 %v713_v16, %v713_v16 }
  0xb7   : > { %826 = vrot.lane.b32.xlu2 %v1988_v17, %s1808_s17  ;;  %828 = vrot.lane.b32.xlu1 %v1988_v17, %s1809_s30  ;;  %s1820_s17 = smov 16   ;;  %s1821_s30 = smov 24  }
  0xb8   : > { %715 = vrot.lane.b32.xlu0 %v1988_v17, %s1810_s15 }
  0xbf   : > { %915 = vrot.lane.b32.xlu2 %v1983_v12, %s1811_s28  ;;  %940 = vrot.lane.b32.xlu1 %v1988_v17, %s1812_s19 }
  0xc0   : > { %917 = vrot.lane.b32.xlu0 %v1983_v12, %s1812_s19 }
  0xc7   : > { %1052 = vrot.lane.b32.xlu2 %v1988_v17, %s1813_s21  ;;  %1029 = vrot.lane.b32.xlu1 %v1983_v12, %s1813_s21 }
  0xc8   : > { %938 = vrot.lane.b32.xlu0 %v1988_v17, %s1811_s28  ;;  %s2186_s28 = sld [smem:[#allocation9_spill]] }
  0xce   : > { %s2187_s19 = scalar_lea.vmem %s2186_s28, %s1907_s27 }
  0xcf   : > { %1050 = vrot.lane.b32.xlu1 %v1988_v17, %s1814_s22 }
  0xd0   : > { %1027 = vrot.lane.b32.xlu0 %v1983_v12, %s1814_s22 }
 0x109   : > { %v804_v18 = vpop.permute.xlu2 %803 }
 0x111   : > { %v827_v23 = vpop.permute.xlu2 %826 }
 0x119   : > { %v916_v28 = vpop.permute.xlu2 %915 }
 0x121   : > { %v806_v19 = vpop.permute.xlu1 %805  ;;  %v1053_v33 = vpop.permute.xlu2 %1052 }
 0x122   : > { %v691_v20 = vpop.permute.xlu0 %690  ;;  %v811_v21 = vsel %vm692_vm2, %v806_v19, 0  ;;  %v1058_v36 = vsel %vm692_vm2, %v1053_v33, 0 }
 0x123   : > { %v697_v22 = vsel %vm692_vm2, %v691_v20, 0  ;;  %820 = vmatpush.bf16.xpose.msrb.mxu0 %v811_v21 }
 0x124   : > { %706 = vmatpush.bf16.xpose.msra.mxu1 %v697_v22 }
 0x129   : > { %v829_v24 = vpop.permute.xlu1 %828 }
 0x12a   : > { %v716_v25 = vpop.permute.xlu0 %715  ;;  %1609 = vmatmul.msk.bf16.vlgmr.msrb.gmra.mxu0 %vm692_vm2, %v804_v18  ;;  %v834_v26 = vsel %vm692_vm2, %v829_v24, 0 }
 0x12b   : > { %1605 = vmatmul.msk.bf16.vlgmr.msra.gmra.mxu1 %vm692_vm2, %v685_v10  ;;  %v721_v27 = vsel %vm692_vm2, %v716_v25, 0 }
 0x12c   : > { %730 = vmatpush.bf16.xpose.msra.mxu2 %v721_v27  ;;  %843 = vmatpush.bf16.xpose.msrb.mxu1 %v834_v26 }
 0x131   : > { %v941_v29 = vpop.permute.xlu1 %940 }
 0x132   : > { %v946_v30 = vsel %vm692_vm2, %v941_v29, 0  ;;  %v918_v31 = vpop.permute.xlu0 %917 }
 0x133   : > { %v923_v32 = vsel %vm692_vm2, %v918_v31, 0  ;;  %1606 = vmatmul.msk.bf16.vlgmr.msra.gmra.mxu2 %vm692_vm2, %v686_v15 }
 0x134   : > { %955 = vmatpush.bf16.xpose.msra.mxu1 %v946_v30  ;;  %932 = vmatpush.bf16.xpose.msra.mxu0 %v923_v32 }
 0x139   : > { %v1030_v34 = vpop.permute.xlu1 %1029 }
 0x13a   : > { %v1035_v35 = vsel %vm692_vm2, %v1030_v34, 0  ;;  %v939_v37 = vpop.permute.xlu0 %938 }
 0x13b   : > { %1610 = vmatmul.msk.bf16.vlgmr.msrb.gmra.mxu1 %vm692_vm2, %v827_v23  ;;  %1613 = vmatmul.msk.bf16.vlgmr.msra.gmra.mxu0 %vm692_vm2, %v916_v28 }
 0x13c   : > { %1067 = vmatpush.bf16.xpose.msrb.mxu1 %v1058_v36  ;;  %1044 = vmatpush.bf16.xpose.msrb.mxu0 %v1035_v35 }
 0x141   : > { %v1051_v39 = vpop.permute.xlu1 %1050 }
 0x142   : > { %v1028_v38 = vpop.permute.xlu0 %1027 }
 0x14b   : > { %1614 = vmatmul.msk.bf16.vlgmr.msra.gmra.mxu1 %vm692_vm2, %v939_v37  ;;  %1617 = vmatmul.msk.bf16.vlgmr.msrb.gmra.mxu0 %vm692_vm2, %v1028_v38 }
 0x15b   : > { %1618 = vmatmul.msk.bf16.vlgmr.msrb.gmra.mxu1 %vm692_vm2, %v1051_v39 }
 0x1a7   : > { %v822_v40 = vpop.f32.mrf.mxu0 }
 0x1a8   : > { %v708_v41 = vpop.f32.mrf.mxu1  ;;  %v849_v42 = vsel %vm692_vm2, %v822_v40, -inf }
 0x1a9   : > { %850 = vmax.xlane.f32.xlu1 %v849_v42  ;;  %v736_v43 = vsel %vm692_vm2, %v708_v41, -inf }
 0x1aa   : > { %737 = vmax.xlane.f32.xlu2 %v736_v43 }
 0x1af   : > { %v824_v44 = vpop.f32.mrf.mxu0 }
 0x1b0   : > { %v710_v45 = vpop.f32.mrf.mxu1 }
 0x1b6   : > { %v732_v46 = vpop.f32.mrf.mxu2 }
 0x1b7   : > { %v739_v47 = vsel %vm692_vm2, %v732_v46, -inf }
 0x1b8   : > { %v845_v48 = vpop.f32.mrf.mxu1  ;;  %740 = vmax.xlane.f32.xlu0 %v739_v47  ;;  %v2020_v49 = vpop.f32.mrf.mxu0 }
 0x1b9   : > { %v852_v50 = vsel %vm692_vm2, %v845_v48, -inf  ;;  %v961_v62 = vsel %vm692_vm2, %v2020_v49, -inf }
 0x1ba   : > { %853 = vmax.xlane.f32.xlu2 %v852_v50 }
 0x1be   : > { %v734_v51 = vpop.f32.mrf.mxu2 }
 0x1c0   : > { %v847_v52 = vpop.f32.mrf.mxu1  ;;  %v936_v53 = vpop.f32.mrf.mxu0 }
 0x1c2   : > { %782 = vrot.lane.b32.xlu1 %v1988_v17, %s1815_s3 }
 0x1c8   : > { %v2024_v54 = vpop.f32.mrf.mxu1  ;;  %v2026_v55 = vpop.f32.mrf.mxu0 }
 0x1c9   : > { %v964_v61 = vsel %vm692_vm2, %v2024_v54, -inf  ;;  %v1073_v63 = vsel %vm692_vm2, %v2026_v55, -inf }
 0x1ca   : > { %894 = vrot.lane.b32.xlu1 %v1988_v17, %s1816_s4 }
 0x1cc   : > { %873 = vrot.lane.b32.xlu0 %v1983_v12, %s1816_s4 }
 0x1d0   : > { %v959_v56 = vpop.f32.mrf.mxu1  ;;  %v1048_v57 = vpop.f32.mrf.mxu0 }
 0x1d2   : > { %760 = vrot.lane.b32.xlu2 %v1983_v12, %s1815_s3  ;;  %s2188_s3 = scalar_lea.vmem %s2166_s6, %s1927_s24 }
 0x1d8   : > { %v1069_v58 = vpop.f32.mrf.mxu1 }
 0x1d9   : > { %v1076_v60 = vsel %vm692_vm2, %v1069_v58, -inf }
 0x1e0   : > { %v1071_v59 = vpop.f32.mrf.mxu1 }
 0x1f4   : > { %1077 = vmax.xlane.f32.xlu1 %v1076_v60 }
 0x1f6   : > { %965 = vmax.xlane.f32.xlu0 %v964_v61 }
 0x1fb   : > { %962 = vmax.xlane.f32.xlu2 %v961_v62 }
 0x1fe   : > { %1074 = vmax.xlane.f32.xlu0 %v1073_v63 }
 0x21c   : > { %v851_v0 = vpop.xlane.xlu1 %850 }
 0x21d   : > { %v855_v1 = vsub.f32 %v822_v40, %v851_v0  ;;  %v738_v2 = vpop.xlane.xlu2 %737 }
 0x21e   : > { %v742_v3 = vsub.f32 %v708_v41, %v738_v2 }
 0x21f   : > { %v857_v6 = vmul.f32 1.442695, %v855_v1 }
 0x220   : > { %v744_v7 = vmul.f32 1.442695, %v742_v3 }
 0x221   : > { %1728 = vpow2.f32 %v857_v6 }
 0x222   : > { %1730 = vpow2.f32 %v744_v7 }
 0x227   : > { %v2038_v8 = vpop.eup %1728 }
 0x228   : > { %v2040_v9 = vpop.eup %1730  ;;  %v861_v10 = vsel %vm692_vm2, %v2038_v8, 0.0 }
 0x229   : > { %v748_v11 = vsel %vm692_vm2, %v2040_v9, 0.0  ;;  %862 = vadd.xlane.f32.xlu0 %v861_v10 }
 0x22a   : > { %749 = vadd.xlane.f32.xlu1 %v748_v11 }
 0x22b   : > { %v741_v13 = vpop.xlane.xlu0 %740 }
 0x22c   : > { %v743_v14 = vsub.f32 %v732_v46, %v741_v13 }
 0x22d   : > { %v854_v15 = vpop.xlane.xlu2 %853 }
 0x22e   : > { %v746_v16 = vmul.f32 1.442695, %v743_v14  ;;  %v856_v18 = vsub.f32 %v845_v48, %v854_v15 }
 0x230   : > { %1732 = vpow2.f32 %v746_v16  ;;  %v859_v19 = vmul.f32 1.442695, %v856_v18 }
 0x232   : > { %1734 = vpow2.f32 %v859_v19 }
 0x234   : > { %v783_v20 = vpop.permute.xlu1 %782 }
 0x235   : > { %v761_v21 = vpop.permute.xlu2 %760  ;;  %v788_v22 = vsel %vm765_vm3, %v783_v20, 0 }
 0x236   : > { %v2047_v23 = vpop.eup %1732  ;;  %v767_v24 = vsel %vm765_vm3, %v761_v21, 0 }
 0x237   : > { %776 = vmatpush.bf16.msra.mxu3 %v767_v24  ;;  %v751_v25 = vsel %vm692_vm2, %v2047_v23, 0.0 }
 0x238   : > { %v2052_v26 = vpop.eup %1734  ;;  %752 = vadd.xlane.f32.xlu0 %v751_v25 }
 0x239   : > { %v864_v27 = vsel %vm692_vm2, %v2052_v26, 0.0 }
 0x23a   : > { %865 = vadd.xlane.f32.xlu2 %v864_v27 }
 0x23b   : > { %797 = vmatpush.bf16.msrb.mxu3 %v788_v22 }
 0x23c   : > { %v895_v30 = vpop.permute.xlu1 %894 }
 0x23d   : > { %v900_v59 = vsel %vm765_vm3, %v895_v30, 0 }
 0x23e   : > { %v874_v28 = vpop.permute.xlu0 %873 }
 0x23f   : > { %v879_v29 = vsel %vm765_vm3, %v874_v28, 0 }
 0x240   : > { %888 = vmatpush.bf16.msrb.mxu2 %v879_v29 }
 0x243   : > { %1006 = vrot.lane.b32.xlu1 %v1988_v17, %s1817_s1 }
 0x252   : > { %985 = vrot.lane.b32.xlu2 %v1983_v12, %s1817_s1 }
 0x267   : > { %v1078_v31 = vpop.xlane.xlu1 %1077 }
 0x268   : > { %v1080_v32 = vsub.f32 %v1069_v58, %v1078_v31 }
 0x269   : > { %v966_v33 = vpop.xlane.xlu0 %965 }
 0x26a   : > { %v968_v34 = vsub.f32 %v2024_v54, %v966_v33  ;;  %v1083_v36 = vmul.f32 1.442695, %v1080_v32 }
 0x26c   : > { %v971_v35 = vmul.f32 1.442695, %v968_v34 }
 0x26e   : > { %1736 = vpow2.f32 %v971_v35  ;;  %v963_v37 = vpop.xlane.xlu2 %962 }
 0x26f   : > { %v967_v38 = vsub.f32 %v2020_v49, %v963_v37  ;;  %1738 = vpow2.f32 %v1083_v36 }
 0x271   : > { %v969_v39 = vmul.f32 1.442695, %v967_v38  ;;  %v1075_v40 = vpop.xlane.xlu0 %1074 }
 0x272   : > { %v1079_v41 = vsub.f32 %v2026_v55, %v1075_v40 }
 0x273   : > { %1740 = vpow2.f32 %v969_v39 }
 0x274   : > { %v1737_v42 = vpop.eup %1736  ;;  %v1081_v43 = vmul.f32 1.442695, %v1079_v41 }
 0x275   : > { %v976_v44 = vsel %vm692_vm2, %v1737_v42, 0.0  ;;  %v2063_v45 = vpop.eup %1738 }
 0x276   : > { %1742 = vpow2.f32 %v1081_v43  ;;  %977 = vadd.xlane.f32.xlu0 %v976_v44  ;;  %v1088_v48 = vsel %vm692_vm2, %v2063_v45, 0.0 }
 0x279   : > { %v1741_v46 = vpop.eup %1740 }
 0x27a   : > { %v973_v47 = vsel %vm692_vm2, %v1741_v46, 0.0 }
 0x27b   : > { %974 = vadd.xlane.f32.xlu1 %v973_v47  ;;  %1089 = vadd.xlane.f32.xlu2 %v1088_v48 }
 0x27c   : > { %v1743_v49 = vpop.eup %1742 }
 0x27d   : > { %v1085_v50 = vsel %vm692_vm2, %v1743_v49, 0.0 }
 0x27e   : > { %1086 = vadd.xlane.f32.xlu0 %v1085_v50  ;;  %v1667_v50 = vld [vmem:[%s1920_s20] sm:$0xff] }
 0x292   : > { %1097 = vrot.lane.b32.xlu0 %v1983_v12, %s1818_s29 }
 0x294   : > { %1118 = vrot.lane.b32.xlu1 %v1988_v17, %s1818_s29 }
 0x29c   : > { %v863_v51 = vpop.xlane.xlu0 %862 }
 0x29d   : > { %v750_v52 = vpop.xlane.xlu1 %749  ;;  %1744 = vrcp.f32 %v863_v51 }
 0x29e   : > { %1746 = vrcp.f32 %v750_v52 }
 0x2a3   : > { %v1745_v53 = vpop.eup %1744 }
 0x2a4   : > { %v1747_v54 = vpop.eup %1746  ;;  %v869_v55 = vmul.f32 %v1745_v53, %v2038_v8 }
 0x2a5   : > { %v756_v56 = vmul.f32 %v1747_v54, %v2040_v9 }
 0x2a6   : > { %v871_v57 = vpack.c.bf16 %v869_v55, %v869_v55 }
 0x2a7   : > { %v758_v58 = vpack.c.bf16 %v756_v56, %v756_v56 }
 0x2a8   : > { %1611 = vmatmul.msk.bf16.vlgmr.msrb.gmra.mxu2 %vm692_vm2, %v871_v57 }
 0x2a9   : > { %1607 = vmatmul.msk.bf16.vlgmr.msra.gmra.mxu3 %vm692_vm2, %v758_v58 }
 0x2aa   : > { %909 = vmatpush.bf16.msra.mxu3 %v900_v59 }
 0x2ab   : > { %v753_v12 = vpop.xlane.xlu0 %752 }
 0x2ac   : > { %1748 = vrcp.f32 %v753_v12 }
 0x2ad   : > { %v866_v17 = vpop.xlane.xlu2 %865 }
 0x2ae   : > { %1750 = vrcp.f32 %v866_v17 }
 0x2b2   : > { %v1749_v60 = vpop.eup %1748 }
 0x2b3   : > { %v757_v61 = vmul.f32 %v1749_v60, %v2047_v23 }
 0x2b4   : > { %v1751_v3 = vpop.eup %1750 }
 0x2b5   : > { %v986_v62 = vpop.permute.xlu2 %985  ;;  %v1007_v0 = vpop.permute.xlu1 %1006  ;;  %v759_v1 = vpack.c.bf16 %v757_v61, %v757_v61  ;;  %v870_v6 = vmul.f32 %v1751_v3, %v2052_v26 }
 0x2b6   : > { %v991_v63 = vsel %vm765_vm3, %v986_v62, 0  ;;  %v1012_v2 = vsel %vm765_vm3, %v1007_v0, 0 }
 0x2b7   : > { %1000 = vmatpush.bf16.msra.mxu2 %v991_v63  ;;  %v872_v7 = vpack.c.bf16 %v870_v6, %v870_v6 }
 0x2b9   : > { %1608 = vmatmul.msk.bf16.vlgmr.msrb.gmra.mxu3 %vm692_vm2, %v759_v1  ;;  %v1725_v1 = vld [vmem:[%s2187_s19] ss:$0 sm:$0xff] }
 0x2ba   : > { %1021 = vmatpush.bf16.msrb.mxu3 %v1012_v2 }
 0x2c9   : > { %1612 = vmatmul.msk.bf16.vlgmr.msra.gmra.mxu3 %vm692_vm2, %v872_v7 }
 0x2e9   : > { %v978_v8 = vpop.xlane.xlu0 %977 }
 0x2ea   : > { %1752 = vrcp.f32 %v978_v8 }
 0x2ee   : > { %v975_v9 = vpop.xlane.xlu1 %974  ;;  %v1090_v16 = vpop.xlane.xlu2 %1089 }
 0x2ef   : > { %1754 = vrcp.f32 %v975_v9 }
 0x2f0   : > { %v1753_v10 = vpop.eup %1752  ;;  %1756 = vrcp.f32 %v1090_v16 }
 0x2f1   : > { %v982_v11 = vmul.f32 %v1753_v10, %v1737_v42  ;;  %v1087_v19 = vpop.xlane.xlu0 %1086 }
 0x2f2   : > { %1758 = vrcp.f32 %v1087_v19 }
 0x2f3   : > { %v984_v13 = vpack.c.bf16 %v982_v11, %v982_v11 }
 0x2f5   : > { %1616 = vmatmul.msk.bf16.vlgmr.msrb.gmra.mxu3 %vm692_vm2, %v984_v13  ;;  %v1755_v14 = vpop.eup %1754  ;;  %v632_v13 = vld [vmem:[%s2188_s3] sm:$0xff] }
 0x2f6   : > { %v981_v15 = vmul.f32 %v1755_v14, %v1741_v46  ;;  %v1757_v20 = vpop.eup %1756  ;;  %v1822_v14 = vmov 0  }
 0x2f7   : > { %v1094_v23 = vmul.f32 %v1757_v20, %v2063_v45  ;;  %1722 = vset.pattern.permute.xlu1 %v1822_v14  ;;  %1721 = vset.pattern.permute.xlu2 %v1822_v14 }
 0x2f8   : > { %v983_v18 = vpack.c.bf16 %v981_v15, %v981_v15  ;;  %v1759_v21 = vpop.eup %1758  ;;  %1723 = vset.pattern.permute.xlu0 %v1822_v14  ;;  %v1727_v14 = vld [vmem:[%s602_s25] ss:$0 sm:$0xff] }
 0x2f9   : > { %v1093_v24 = vmul.f32 %v1759_v21, %v1743_v49  ;;  %v1096_v28 = vpack.c.bf16 %v1094_v23, %v1094_v23  ;;  %v1668_v49 = vld [vmem:[%s1920_s20 + $0x8] sm:$0xff] }
 0x2fa   : > { %1615 = vmatmul.msk.bf16.vlgmr.msra.gmra.mxu2 %vm692_vm2, %v983_v18  ;;  %1196 = vmatpush.bf16.msra.mxu0 %v1668_v49  ;;  %v1674_v49 = vld [vmem:[%s1954_s5 + $0x18] sm:$0xff] }
 0x2fb   : > { %v1095_v29 = vpack.c.bf16 %v1093_v24, %v1093_v24 }
 0x2fe   : > { %1197 = vmatpush.bf16.msra.mxu0 %v1667_v50  ;;  %v1673_v50 = vld [vmem:[%s1954_s5 + $0x10] sm:$0xff] }
 0x304   : > { %v1098_v22 = vpop.permute.xlu0 %1097 }
 0x305   : > { %v1103_v25 = vsel %vm765_vm3, %v1098_v22, 0 }
 0x306   : > { %v1119_v26 = vpop.permute.xlu1 %1118  ;;  %1112 = vmatpush.bf16.msrb.mxu2 %v1103_v25 }
 0x307   : > { %v1124_v27 = vsel %vm765_vm3, %v1119_v26, 0  ;;  %v1670_v26 = vld [vmem:[%s1940_s14 + $0x8] sm:$0xff] }
 0x308   : > { %1133 = vmatpush.bf16.msra.mxu3 %v1124_v27  ;;  %1278 = vmatpush.bf16.msra.mxu1 %v1670_v26  ;;  %v1669_v27 = vld [vmem:[%s1940_s14] sm:$0xff] }
 0x30a   : > { %1619 = vmatmul.msk.bf16.vlgmr.msrb.gmra.mxu2 %vm692_vm2, %v1095_v29 }
 0x30b   : > { %1620 = vmatmul.msk.bf16.vlgmr.msra.gmra.mxu3 %vm692_vm2, %v1096_v28  ;;  %1340 = vmatpush.bf16.msra.mxu2 %v1674_v49 }
 0x30c   : > { %1279 = vmatpush.bf16.msra.mxu1 %v1669_v27 }
 0x30f   : > { %1341 = vmatpush.bf16.msra.mxu2 %v1673_v50 }
 0x32b   : > { %v890_v30 = vpop.f32.mrf.mxu2 }
 0x32c   : > { %v778_v31 = vpop.f32.mrf.mxu3 }
 0x333   : > { %v892_v32 = vpop.f32.mrf.mxu2 }
 0x334   : > { %v780_v33 = vpop.f32.mrf.mxu3 }
 0x33c   : > { %v799_v34 = vpop.f32.mrf.mxu3 }
 0x344   : > { %v801_v35 = vpop.f32.mrf.mxu3 }
 0x34c   : > { %v911_v36 = vpop.f32.mrf.mxu3 }
 0x34d   : > { %v1706_v37 = vpack.i.bf16 %v911_v36, %v890_v30 }
 0x34f   : > { %1707 = vrot.lane.b32.xlu0 %v1706_v37, %s1819_s13 }
 0x354   : > { %v913_v38 = vpop.f32.mrf.mxu3 }
 0x378   : > { %v1023_v39 = vpop.f32.mrf.mxu3 }
 0x37d   : > { %v1002_v40 = vpop.f32.mrf.mxu2 }
 0x37e   : > { %v1711_v41 = vpack.i.bf16 %v1023_v39, %v1002_v40 }
 0x380   : > { %v1025_v42 = vpop.f32.mrf.mxu3  ;;  %1712 = vrot.lane.b32.xlu1 %v1711_v41, %s1820_s17 }
 0x385   : > { %v1004_v43 = vpop.f32.mrf.mxu2 }
 0x38d   : > { %v1114_v44 = vpop.f32.mrf.mxu2 }
 0x38e   : > { %v1135_v45 = vpop.f32.mrf.mxu3 }
 0x38f   : > { %v1716_v46 = vpack.i.bf16 %v1135_v45, %v1114_v44 }
 0x391   : > { %1717 = vrot.lane.b32.xlu0 %v1716_v46, %s1821_s30 }
 0x395   : > { %v1116_v47 = vpop.f32.mrf.mxu2 }
 0x396   : > { %v1137_v48 = vpop.f32.mrf.mxu3 }
 0x3c1   : > { %v1708_v51 = vpop.permute.xlu0 %1707 }
 0x3c2   : > { %v1710_v53 = vunpack.i.h.bf16 %v1708_v51  ;;  %v1709_v54 = vunpack.i.l.bf16 %v1708_v51  ;;  %v1672_v51 = vld [vmem:[%s1954_s5 + $0x8] sm:$0xff] }
 0x3c3   : > { %1342 = vmatpush.bf16.msra.mxu2 %v1672_v51 }
 0x3c4   : > { %v1164_v58 = vsel %vm692_vm2, %v799_v34, %v1710_v53  ;;  %v1163_v59 = vsel %vm692_vm2, %v778_v31, %v1709_v54  ;;  %v1726_v53 = vld [vmem:[%s594_s23] ss:$0 sm:$0xff] }
 0x3f2   : > { %v1713_v52 = vpop.permute.xlu1 %1712 }
 0x3f3   : > { %v1715_v55 = vunpack.i.h.bf16 %v1713_v52  ;;  %v1714_v56 = vunpack.i.l.bf16 %v1713_v52  ;;  %v1671_v52 = vld [vmem:[%s1954_s5] sm:$0xff] }
 0x3f4   : > { %1343 = vmatpush.bf16.msra.mxu2 %v1671_v52 }
 0x3f5   : > { %v1166_v60 = vsel %vm1165_vm4, %v1163_v59, %v1714_v56  ;;  %v1167_v61 = vsel %vm1165_vm4, %v1164_v58, %v1715_v55 }
 0x403   : > { %v1718_v57 = vpop.permute.xlu0 %1717 }
 0x404   : > { %v1720_v12 = vunpack.i.h.bf16 %v1718_v57  ;;  %v1719_v17 = vunpack.i.l.bf16 %v1718_v57 }
 0x406   : > { %v1169_v62 = vsel %vm1168_vm5, %v1166_v60, %v1719_v17  ;;  %v1170_v63 = vsel %vm1168_vm5, %v1167_v61, %v1720_v12 }
 0x407   : > { %v1171_v0 = vpack.c.bf16 %v1170_v63, %v1169_v62 }
 0x409   : > { %1629 = vmatmul.msk.bf16.vlgmr.msra.gmra.mxu0 %vm667_vm1, %v1171_v0 }
 0x486   : > { %v1199_v2 = vpop.f32.mrf.mxu0 }
 0x487   : > { %v1200_v3 = vadd.f32 %v1725_v1, %v1199_v2 }
 0x489   : > { %v1204_v6 = vadd.f32 %v1200_v3, %v1971_v4  ;;  %v647_v4 = vld [vmem:[%s606_s18] sm:$0xff]  ;;  %s2189_s18 = sld [smem:[#allocation10_spill]] }
 0x48b   : > { %v1206_v7 = vsel %vm667_vm1, %v1204_v6, 0.0 }
 0x48c   : > { %1207 = vadd.xlane.f32.xlu1 %v1206_v7 }
 0x48e   : > { %v1201_v8 = vpop.f32.mrf.mxu0 }
 0x48f   : > { %v1202_v9 = vadd.f32 %v1725_v1, %v1201_v8  ;;  %s2190_s30 = scalar_lea.vmem %s2189_s18, %s1927_s24 }
 0x490   : > { %v631_v25 = vld [vmem:[%s2190_s30] sm:$0xff] }
 0x491   : > { %v1205_v10 = vadd.f32 %v1202_v9, %v1973_v5 }
 0x493   : > { %v1209_v11 = vsel %vm667_vm1, %v1205_v10, 0.0 }
 0x494   : > { %1210 = vadd.xlane.f32.xlu2 %v1209_v11 }
 0x4a5   : > { %1248 = vperm.xlu1 %1722, %v632_v13  }
 0x4ad   : > { %1387 = vperm.xlu1 %1722, %v647_v4  }
 0x4ff   : > { %v1208_v5 = vpop.xlane.xlu1 %1207 }
 0x507   : > { %v1211_v15 = vpop.xlane.xlu2 %1210 }
 0x508   : > { %v1212_v16 = vadd.f32 %v1211_v15, %v1208_v5 }
 0x50a   : > { %v1213_v18 = vmul.f32 0.015625, %v1212_v16 }
 0x50c   : > { %v1214_v19 = vsub.f32 %v1204_v6, %v1213_v18  ;;  %v1215_v20 = vsub.f32 %v1205_v10, %v1213_v18 }
 0x50e   : > { %v1217_v21 = vmul.f32 %v1215_v20, %v1215_v20  ;;  %v1216_v22 = vmul.f32 %v1214_v19, %v1214_v19 }
 0x510   : > { %v1221_v23 = vsel %vm667_vm1, %v1217_v21, 0.0  ;;  %v1218_v24 = vsel %vm667_vm1, %v1216_v22, 0.0 }
 0x511   : > { %1222 = vadd.xlane.f32.xlu2 %v1221_v23  ;;  %1219 = vadd.xlane.f32.xlu0 %v1218_v24 }
 0x517   : > { %v1249_v45 = vpop.permute.xlu1 %1248 }
 0x529   : > { %1241 = vperm.xlu2 %1721, %v631_v25  }
 0x584   : > { %v1223_v28 = vpop.xlane.xlu2 %1222  ;;  %v1220_v29 = vpop.xlane.xlu0 %1219 }
 0x585   : > { %v1224_v30 = vadd.f32 %v1223_v28, %v1220_v29 }
 0x587   : > { %v1225_v31 = vmul.f32 0.015625, %v1224_v30 }
 0x589   : > { %v1226_v32 = vadd.f32 1e-05, %v1225_v31 }
 0x58b   : > { %1760 = vrsqrt.f32 %v1226_v32  ;;  %vm1233_vm7 = vweird.f32 %v1226_v32 }
 0x58c   : > { %v1242_v39 = vpop.permute.xlu2 %1241 }
 0x591   : > { %v1761_v33 = vpop.eup %1760 }
 0x592   : > { %v1228_v34 = vmul.f32 %v1761_v33, %v1226_v32  ;;  %vm1234_vm6 = vweird.f32 %v1761_v33  ;;  %v648_v32 = vld [vmem:[%s610_s16] sm:$0xff] }
 0x593   : > { %vm1235_vm8 = vmor %vm1233_vm7, %vm1234_vm6 }
 0x594   : > { %v1229_v35 = vmul.f32 %v1761_v33, %v1228_v34 }
 0x596   : > { %v1230_v36 = vmul.f32 0.5, %v1229_v35 }
 0x598   : > { %v1231_v37 = vsub.f32 1.5, %v1230_v36 }
 0x59a   : > { %v1232_v38 = vmul.f32 %v1761_v33, %v1231_v37 }
 0x59c   : > { %v1236_v40 = vsel %vm1235_vm8, %v1761_v33, %v1232_v38 }
 0x59d   : > { %v1237_v41 = vmul.f32 %v1236_v40, %v1214_v19  ;;  %v1238_v42 = vmul.f32 %v1236_v40, %v1215_v20 }
 0x59f   : > { %v1244_v43 = vmul.f32 %v1242_v39, %v1237_v41  ;;  %v1245_v44 = vmul.f32 %v1242_v39, %v1238_v42 }
 0x5a1   : > { %v1251_v46 = vadd.f32 %v1249_v45, %v1244_v43  ;;  %v1252_v47 = vadd.f32 %v1249_v45, %v1245_v44 }
 0x5a3   : > { %v1253_v48 = vpack.c.bf16 %v1252_v47, %v1251_v46 }
 0x5a5   : > { %1638 = vmatmul.msk.bf16.vlgmr.msra.gmra.mxu1 %vm667_vm1, %v1253_v48 }
 0x622   : > { %v1281_v54 = vpop.f32.mrf.mxu1 }
 0x623   : > { %v1282_v55 = vadd.f32 %v1726_v53, %v1281_v54 }
 0x625   : > { %v1288_v56 = vmul.f32 0.044715, %v1282_v55  ;;  %v1286_v7 = vmul.f32 0.5, %v1282_v55 }
 0x627   : > { %v1290_v57 = vmul.f32 %v1288_v56, %v1282_v55 }
 0x629   : > { %v1292_v58 = vmul.f32 %v1290_v57, %v1282_v55 }
 0x62a   : > { %v1283_v59 = vpop.f32.mrf.mxu1 }
 0x62b   : > { %v1294_v12 = vadd.f32 %v1292_v58, %v1282_v55  ;;  %v1284_v17 = vadd.f32 %v1726_v53, %v1283_v59 }
 0x62d   : > { %v1289_v60 = vmul.f32 0.044715, %v1284_v17  ;;  %v1296_v61 = vmul.f32 0.7978846, %v1294_v12  ;;  %v1287_v8 = vmul.f32 0.5, %v1284_v17 }
 0x62f   : > { %v1291_v62 = vmul.f32 %v1289_v60, %v1284_v17  ;;  %1762 = vtanh.f32 %v1296_v61 }
 0x631   : > { %v1293_v63 = vmul.f32 %v1291_v62, %v1284_v17 }
 0x633   : > { %v1295_v0 = vadd.f32 %v1293_v63, %v1284_v17 }
 0x635   : > { %v1297_v1 = vmul.f32 0.7978846, %v1295_v0  ;;  %v1763_v2 = vpop.eup %1762 }
 0x636   : > { %v1300_v3 = vadd.f32 1.0, %v1763_v2 }
 0x637   : > { %1764 = vtanh.f32 %v1297_v1 }
 0x638   : > { %v1302_v10 = vmul.f32 %v1300_v3, %v1286_v7 }
 0x63d   : > { %v1765_v6 = vpop.eup %1764 }
 0x63e   : > { %v1301_v9 = vadd.f32 1.0, %v1765_v6 }
 0x640   : > { %v1303_v11 = vmul.f32 %v1301_v9, %v1287_v8 }
 0x642   : > { %v1304_v13 = vpack.c.bf16 %v1303_v11, %v1302_v10 }
 0x644   : > { %1655 = vmatmul.msk.bf16.vlgmr.msra.gmra.mxu2 %vm1332_vm9, %v1304_v13 }
 0x6c7   : > { %v1345_v4 = vpop.f32.mrf.mxu2 }
 0x6c8   : > { %v1346_v5 = vadd.f32 %v1727_v14, %v1345_v4 }
 0x6ca   : > { %v1350_v15 = vadd.f32 %v1346_v5, %v1251_v46 }
 0x6cc   : > { %v1352_v16 = vsel %vm667_vm1, %v1350_v15, 0.0 }
 0x6cd   : > { %1353 = vadd.xlane.f32.xlu2 %v1352_v16 }
 0x6cf   : > { %v1347_v18 = vpop.f32.mrf.mxu2 }
 0x6d0   : > { %v1348_v19 = vadd.f32 %v1727_v14, %v1347_v18 }
 0x6d2   : > { %v1351_v20 = vadd.f32 %v1348_v19, %v1252_v47  ;;  %v1388_v47 = vpop.permute.xlu1 %1387 }
 0x6d4   : > { %v1355_v21 = vsel %vm667_vm1, %v1351_v20, 0.0 }
 0x6d5   : > { %1356 = vadd.xlane.f32.xlu0 %v1355_v21 }
 0x740   : > { %v1354_v22 = vpop.xlane.xlu2 %1353 }
 0x748   : > { %v1357_v23 = vpop.xlane.xlu0 %1356 }
 0x749   : > { %v1358_v24 = vadd.f32 %v1357_v23, %v1354_v22 }
 0x74b   : > { %v1359_v25 = vmul.f32 0.015625, %v1358_v24 }
 0x74d   : > { %v1360_v26 = vsub.f32 %v1350_v15, %v1359_v25  ;;  %v1361_v28 = vsub.f32 %v1351_v20, %v1359_v25 }
 0x74f   : > { %v1362_v27 = vmul.f32 %v1360_v26, %v1360_v26  ;;  %v1363_v30 = vmul.f32 %v1361_v28, %v1361_v28 }
 0x751   : > { %v1364_v29 = vsel %vm667_vm1, %v1362_v27, 0.0  ;;  %v1367_v31 = vsel %vm667_vm1, %v1363_v30, 0.0 }
 0x752   : > { %1365 = vadd.xlane.f32.xlu0 %v1364_v29 }
 0x75a   : > { %1368 = vadd.xlane.f32.xlu0 %v1367_v31 }
 0x76e   : > { %1394 = vperm.xlu0 %1723, %v648_v32  }
 0x7c5   : > { %v1366_v33 = vpop.xlane.xlu0 %1365 }
 0x7cd   : > { %v1369_v34 = vpop.xlane.xlu0 %1368 }
 0x7ce   : > { %v1370_v35 = vadd.f32 %v1369_v34, %v1366_v33 }
 0x7d0   : > { %v1371_v36 = vmul.f32 0.015625, %v1370_v35 }
 0x7d2   : > { %v1372_v37 = vadd.f32 1e-05, %v1371_v36 }
 0x7d4   : > { %1766 = vrsqrt.f32 %v1372_v37  ;;  %vm1379_vm11 = vweird.f32 %v1372_v37 }
 0x7da   : > { %v1767_v38 = vpop.eup %1766 }
 0x7db   : > { %v1374_v39 = vmul.f32 %v1767_v38, %v1372_v37  ;;  %vm1380_vm10 = vweird.f32 %v1767_v38 }
 0x7dc   : > { %vm1381_vm12 = vmor %vm1379_vm11, %vm1380_vm10 }
 0x7dd   : > { %v1375_v40 = vmul.f32 %v1767_v38, %v1374_v39 }
 0x7df   : > { %v1376_v41 = vmul.f32 0.5, %v1375_v40 }
 0x7e0   : > { %v1395_v48 = vpop.permute.xlu0 %1394 }
 0x7e1   : > { %v1377_v42 = vsub.f32 1.5, %v1376_v41 }
 0x7e3   : > { %v1378_v43 = vmul.f32 %v1767_v38, %v1377_v42 }
 0x7e5   : > { %v1382_v44 = vsel %vm1381_vm12, %v1767_v38, %v1378_v43 }
 0x7e6   : > { %v1383_v45 = vmul.f32 %v1382_v44, %v1360_v26  ;;  %v1384_v46 = vmul.f32 %v1382_v44, %v1361_v28 }
 0x7e8   : > { %v1390_v49 = vmul.f32 %v1388_v47, %v1383_v45  ;;  %v1391_v50 = vmul.f32 %v1388_v47, %v1384_v46 }
 0x7e9   : > { %1404 = sbr.rel (%p1656_p5) target bundleno = 2038 (0x7f6), region = 80 }
 0x7ea   : > { %v1397_v51 = vadd.f32 %v1395_v48, %v1390_v49  ;;  %v1398_v52 = vadd.f32 %v1395_v48, %v1391_v50 }
 0x7ec   : > { %1399 = vst.msk [vmem:[#allocation2] sm:$0xff] %vm667_vm1, %v1397_v51 }
 0x7ed   : > { %1400 = vst.msk [vmem:[#allocation2 + $0x8] sm:$0xff] %vm667_vm1, %v1398_v52 }
 0x7f3   : > { %v1405_v53 = vld [vmem:[#allocation2] sm:$0xff] }
 0x7f4   : > { %v1406_v54 = vld [vmem:[#allocation2 + $0x8] sm:$0xff]  ;;  %1407 = vst.msk [vmem:[#allocation3] sm:$0xff] %vm667_vm1, %v1405_v53 }
 0x7f5   : > { %1408 = vst.msk [vmem:[#allocation3 + $0x8] sm:$0xff] %vm667_vm1, %v1406_v54 }
 0x7f6 PF: > { %p1679_p6 = scmp.eq.s32.totalorder %s1901_s26, 1  ;;  %s1823_s24 = smov [#allocation3]  }
 0x7f7   : > { %s1414_s16 = sshll.u32 %s1823_s24, 4  ;;  %s2191_s19 = sld [smem:[#allocation11_spill]]  ;;  %s1415_s16 = int_to_ptr.vmem [resolvable:$true] %s1414_s16 }
 0x7f8   : > { %s1824_s22 = smov 128  }
 0x7fd   : > { %s1416_s21 = sshll.u32 %s2191_s19, 4  ;;  %s1417_s21 = int_to_ptr.hbm [resolvable:$true] %s1416_s21 }
 0x7fe   : > { %1676 = dma.vmem_to_hbm [thread:$0]  (%p1679_p6), %s1415_s16, 256, %s1417_s21, [#allocation4], %s1824_s22, %s1824_s22, %s1819_s13  }
 0x7ff   : > { %1801 = dma.done.wait (%p1679_p6), [#allocation4], 256  }
 0x800   : > { %1803 = vsyncadd (%p1679_p6), [#allocation4], 4294967040 }
 0x801 PF: > { %s2192_s3 = sld [smem:[#allocation6_spill]] }
 0x807   : > { %s24_s25 = sadd.s32 1, %s2192_s3  }
 0x808   : > { %p21_p7 = scmp.ge.s32.totalorder %s24_s25, 4  }
 0x80a   :  { %23 = sbr.rel (!%p21_p7) target bundleno = 7 (0x7), region = 140 }
 0x80f   :  { %1433 = vsyncpa [#allocation4], 1 }
 0x810   :  { %1435 = vsyncpa [#allocation4 + $0x1], 1 }

</bundles_post_ra>
